<compile_context>
chip_gen: v6e
topology: v6e:2x2x1
jax: 0.10.0
libtpu: 0.0.40
codegen_flags: <defaults>
</compile_context>

<pallas_src>
import functools

import jax
import jax.numpy as jnp
from jax.experimental import pallas as pl
from jax.experimental.pallas import tpu as pltpu


def _round_up(n, m):
    return ((n + m - 1) // m) * m


def _vmem_limit_bytes():
    """Generation-aware scoped-VMEM cap (leave headroom for double buffers)."""
    cap = 128 * 2**20
    try:
        info = pltpu.get_tpu_info()
        cap = int(getattr(info, "vmem_capacity_bytes", cap))
    except Exception:
        pass
    return int(max(16 * 2**20, min(cap - cap // 4, 96 * 2**20)))


def _pick_strip_rows(H, W, Cp, requested=None):
    """Rows per strip; always a divisor of H so every strip is full-size."""
    if requested is None:
        per_row = 10 * (W + 2) * Cp * 4          # scratch + blocks + temporaries
        requested = max(8, (4 * 2**20) // per_row)
    th = max(1, min(H, int(requested)))
    while H % th:
        th -= 1
    return th


def _dsf_kernel(x_ref, halo_ref, w1_ref, b1_ref, dw_ref, wf_ref, bf_ref,
                o_ref, pad_ref, *, TH, W, Cout):
    i = pl.program_id(1)
    last = pl.num_programs(1) - 1
    Cp = pad_ref.shape[2]
    Cin = x_ref.shape[3]

    w1 = w1_ref[...]                      # (Cin, Cp)  BN1 scale pre-folded
    b1 = b1_ref[...]                      # (1, Cp)    BN1 shift

    # ---- conv1 (1x1) + BN1 on the strip rows and the 2 halo rows -----------
    x = x_ref[0].reshape(TH * W, Cin)
    y = jnp.dot(x, w1, preferred_element_type=jnp.float32) + b1     # (TH*W, Cp)
    xh = halo_ref[0].reshape(2 * W, Cin)
    yh = (jnp.dot(xh, w1, preferred_element_type=jnp.float32) + b1
          ).reshape(2, W, Cp)

    # ---- fill the (TH+2, W+2, Cp) zero-padded scratch -----------------------
    pad_ref[:, 0:1, :] = jnp.zeros((TH + 2, 1, Cp), jnp.float32)
    pad_ref[:, W + 1:W + 2, :] = jnp.zeros((TH + 2, 1, Cp), jnp.float32)
    pad_ref[1:TH + 1, 1:W + 1, :] = y.reshape(TH, W, Cp)
    pad_ref[0:1, 1:W + 1, :] = yh[0:1]
    pad_ref[TH + 1:TH + 2, 1:W + 1, :] = yh[1:2]

    # Depthwise zero padding applies to the BN1 output, so at the image border
    # the halo row must be exactly 0 (conv1(0) + b1 == b1 != 0).
    @pl.when(i == 0)
    def _():
        pad_ref[0:1, :, :] = jnp.zeros((1, W + 2, Cp), jnp.float32)

    @pl.when(i == last)
    def _():
        pad_ref[TH + 1:TH + 2, :, :] = jnp.zeros((1, W + 2, Cp), jnp.float32)

    # ---- depthwise 3x3 (pad=1): 9 shifted window reads + tap FMAs ----------
    dw = dw_ref[...]                                            # (9, Cp)
    acc = jnp.zeros((TH, W, Cp), jnp.float32)
    for di in range(3):
        for dj in range(3):
            win = pad_ref[di:di + TH, dj:dj + W, :]
            acc = acc + win * dw[di * 3 + dj].reshape(1, 1, Cp)

    # ---- fused (point_conv -> BN2 -> conv_1x1) matmul + bias + ReLU --------
    lhs = acc.reshape(TH * W, Cp).astype(wf_ref.dtype)          # bf16 on v6e/v7x
    out = jnp.dot(lhs, wf_ref[...], preferred_element_type=jnp.float32)
    out = jnp.maximum(out + bf_ref[...], 0.0).reshape(TH, W, Cp)
    # Write only the real Cout channels back to HBM (masked store).
    o_ref[0] = out[:, :, :Cout].astype(o_ref.dtype)


def dsf_forward(x_nchw, p, stride=1, *, use_bf16_matmul=True, strip_rows=None):
    assert stride == 1, "only stride=1 supported"
    N, Cin, H, W = x_nchw.shape
    Cout = p["w1"].shape[1]
    Cp = _round_up(Cout, 128)        # lane-dense channel dim inside the kernel
    eps = 1e-5
    hp = jax.lax.Precision.HIGHEST

    # ---- eval-mode BN folding to per-channel scale/shift --------------------
    s1 = p["gamma1"] / jnp.sqrt(p["rv1"] + eps)
    b1 = p["beta1"] - p["rm1"] * s1
    s2 = p["gamma2"] / jnp.sqrt(p["rv2"] + eps)
    b2 = p["beta2"] - p["rm2"] * s2

    # Fold BN1 scale into conv1; fuse point_conv + BN2 + conv_1x1 into one
    # matmul.  One-time folds at HIGHEST precision (exact algebraic fusion).
    w1f = p["w1"] * s1[None, :]                                   # (Cin, Cout)
    wf = jnp.dot(p["wp"] * s2[None, :], p["w3"], precision=hp)    # (Cout, Cout)
    bf = (jnp.dot(p["wpb"] * s2 + b2, p["w3"], precision=hp)
          + jnp.dot(p["dwb"], wf, precision=hp))                  # (Cout,)

    def padc(a):  # zero-pad the channel (last) axis to Cp
        return jnp.pad(a, [(0, 0)] * (a.ndim - 1) + [(0, Cp - a.shape[-1])])

    mm_dtype = jnp.bfloat16 if use_bf16_matmul else jnp.float32
    w1_p = padc(w1f)                                              # (Cin, Cp)
    b1_p = padc(b1.reshape(1, Cout))                              # (1, Cp)
    dw_p = padc(p["dw33"].reshape(9, Cout))                       # (9, Cp)
    wf_p = jnp.pad(wf, ((0, Cp - Cout), (0, Cp - Cout))).astype(mm_dtype)
    bf_p = padc(bf.reshape(1, Cout))                              # (1, Cp)

    # ---- layout: NCHW -> NHWC (channels on the lane axis) -------------------
    x2 = jnp.transpose(x_nchw, (0, 2, 3, 1)).astype(jnp.float32)  # (N,H,W,Cin)

    # ---- H-strip tiling with a 1-row halo ------------------------------------
    TH = _pick_strip_rows(H, W, Cp, strip_rows)
    n_strips = H // TH
    # Halo rows for strip i: global rows i*TH-1 and (i+1)*TH (zero x-rows at
    # the image border; the kernel zeroes their conv1 output there).
    zrow = jnp.zeros((N, 1, W, Cin), jnp.float32)
    xz = jnp.concatenate([zrow, x2, zrow], axis=1)                # (N, H+2, W, Cin)
    halo = jnp.stack([xz[:, 0:H:TH], xz[:, TH + 1::TH]], axis=2)  # (N,S,2,W,Cin)
    halo = halo.reshape(N, n_strips * 2, W, Cin)

    kernel = functools.partial(_dsf_kernel, TH=TH, W=W, Cout=Cout)
    out_nhwc = pl.pallas_call(
        kernel,
        out_shape=jax.ShapeDtypeStruct((N, H, W, Cout), jnp.float32),
        grid=(N, n_strips),
        in_specs=[
            pl.BlockSpec((1, TH, W, Cin), lambda n, i: (n, i, 0, 0)),  # x strip
            pl.BlockSpec((1, 2, W, Cin), lambda n, i: (n, i, 0, 0)),   # halo rows
            pl.BlockSpec((Cin, Cp), lambda n, i: (0, 0)),              # conv1 w (BN1 folded)
            pl.BlockSpec((1, Cp), lambda n, i: (0, 0)),                # b1
            pl.BlockSpec((9, Cp), lambda n, i: (0, 0)),                # depthwise taps
            pl.BlockSpec((Cp, Cp), lambda n, i: (0, 0)),               # fused tail weight
            pl.BlockSpec((1, Cp), lambda n, i: (0, 0)),                # fused tail bias
        ],
        out_specs=pl.BlockSpec((1, TH, W, Cout), lambda n, i: (n, i, 0, 0)),
        scratch_shapes=[pltpu.VMEM((TH + 2, W + 2, Cp), jnp.float32)],
        compiler_params=pltpu.CompilerParams(
            dimension_semantics=("parallel", "parallel"),
            vmem_limit_bytes=_vmem_limit_bytes()),
    )(x2, halo, w1_p, b1_p, dw_p, wf_p, bf_p)

    return jnp.transpose(out_nhwc, (0, 3, 1, 2))                  # back to NCHW


def ref_forward(x_nchw, p):
    """Pure-JAX reference, op-for-op with the PyTorch module (eval-mode BN)."""
    eps = 1e-5
    s1 = p["gamma1"] / jnp.sqrt(p["rv1"] + eps)
    b1 = p["beta1"] - p["rm1"] * s1
    s2 = p["gamma2"] / jnp.sqrt(p["rv2"] + eps)
    b2 = p["beta2"] - p["rm2"] * s2

    hp = jax.lax.Precision.HIGHEST
    x = jnp.transpose(x_nchw, (0, 2, 3, 1)).astype(jnp.float32)
    N, H, W, _ = x.shape
    y = jnp.einsum("nhwc,cd->nhwd", x, p["w1"], precision=hp)
    y = y * s1 + b1
    yp = jnp.pad(y, ((0, 0), (1, 1), (1, 1), (0, 0)))
    acc = jnp.zeros_like(y)
    for di in range(3):
        for dj in range(3):
            acc = acc + yp[:, di:di + H, dj:dj + W, :] * p["dw33"][di, dj]
    acc = acc + p["dwb"]
    z = jnp.einsum("nhwc,cd->nhwd", acc, p["wp"], precision=hp) + p["wpb"]
    z = z * s2 + b2
    out = jnp.einsum("nhwc,cd->nhwd", z, p["w3"], precision=hp)
    out = jnp.maximum(out, 0.0)
    return jnp.transpose(out, (0, 3, 1, 2))


def make_params(key, Cin, Cout):
    ks = jax.random.split(key, 16)
    n = lambda k, shape, scale=0.1: scale * jax.random.normal(k, shape, jnp.float32)
    return {
        # conv1: PyTorch (Cout, Cin, 1, 1) stored transposed as (Cin, Cout)
        "w1": n(ks[0], (Cin, Cout)),
        "gamma1": 1.0 + n(ks[1], (Cout,)),
        "beta1": n(ks[2], (Cout,)),
        "rm1": n(ks[3], (Cout,)),
        "rv1": 1.0 + jnp.abs(n(ks[4], (Cout,))),
        # depth_conv: PyTorch (Cout, 1, 3, 3) stored as (3, 3, Cout)
        "dw33": n(ks[5], (3, 3, Cout)),
        "dwb": n(ks[6], (Cout,)),
        # point_conv: PyTorch (Cout, Cout, 1, 1) stored transposed (Cin->Cout)
        "wp": n(ks[7], (Cout, Cout)),
        "wpb": n(ks[8], (Cout,)),
        "gamma2": 1.0 + n(ks[9], (Cout,)),
        "beta2": n(ks[10], (Cout,)),
        "rm2": n(ks[11], (Cout,)),
        "rv2": 1.0 + jnp.abs(n(ks[12], (Cout,))),
        # conv_1x1: PyTorch (Cout, Cout, 1, 1) stored transposed
        "w3": n(ks[13], (Cout, Cout)),
    }


if __name__ == "__main__":
    key = jax.random.PRNGKey(0)
    kx, kp = jax.random.split(key)

    N, Cin, H, W = 2, 4, 16, 16
    Cout = 8
    x = jax.random.normal(kx, (N, Cin, H, W), jnp.float32)
    params = make_params(kp, Cin, Cout)

    ref = jax.block_until_ready(ref_forward(x, params))

    # f32 MXU path, forced 2 H-strips (exercises halo + border zeroing).
    out = jax.block_until_ready(
        dsf_forward(x, params, use_bf16_matmul=False, strip_rows=8))
    assert out.shape == (N, Cout, H, W), out.shape
    assert jnp.allclose(out, ref, atol=1e-3, rtol=1e-3), (
        float(jnp.max(jnp.abs(out - ref))))

    # Default fast path: auto strip size + bf16 feed of the dominant matmul
    # (tolerance loosened only for the bf16 cast of the tail-matmul inputs).
    out_fast = jax.block_until_ready(dsf_forward(x, params))
    assert out_fast.shape == (N, Cout, H, W), out_fast.shape
    assert jnp.allclose(out_fast, ref, atol=2e-2, rtol=2e-2), (
        float(jnp.max(jnp.abs(out_fast - ref))))

    print("KERNEL_OK")
</pallas_src>

<mosaic_0001>
module attributes {stable_mosaic.version = 11 : i64} {
  func.func @_dsf_kernel(%arg0: i32, %arg1: i32, %arg2: memref<1x8x16x4xf32, #tpu.memory_space<vmem>>, %arg3: memref<1x2x16x4xf32, #tpu.memory_space<vmem>>, %arg4: memref<4x128xf32, #tpu.memory_space<vmem>>, %arg5: memref<1x128xf32, #tpu.memory_space<vmem>>, %arg6: memref<9x128xf32, #tpu.memory_space<vmem>>, %arg7: memref<128x128xf32, #tpu.memory_space<vmem>>, %arg8: memref<1x128xf32, #tpu.memory_space<vmem>>, %arg9: memref<1x8x16x8xf32, #tpu.memory_space<vmem>>, %arg10: memref<10x18x128xf32, #tpu.memory_space<vmem>>) attributes {dimension_semantics = [#tpu.dimension_semantics<parallel>, #tpu.dimension_semantics<parallel>], iteration_bounds = array<i64: 2, 2>, scalar_prefetch = 0 : i64, scratch_operands = 1 : i64, tpu.core_type = #tpu.core_type<tc>, window_params = [{transform_indices = @transform_0, window_bounds = array<i64: 1, 8, 16, 4>}, {transform_indices = @transform_1, window_bounds = array<i64: 1, 2, 16, 4>}, {pipeline_mode = #tpu.pipeline_mode<synchronous>, transform_indices = @transform_2, window_bounds = array<i64: 4, 128>}, {pipeline_mode = #tpu.pipeline_mode<synchronous>, transform_indices = @transform_3, window_bounds = array<i64: 1, 128>}, {pipeline_mode = #tpu.pipeline_mode<synchronous>, transform_indices = @transform_4, window_bounds = array<i64: 9, 128>}, {pipeline_mode = #tpu.pipeline_mode<synchronous>, transform_indices = @transform_5, window_bounds = array<i64: 128, 128>}, {pipeline_mode = #tpu.pipeline_mode<synchronous>, transform_indices = @transform_6, window_bounds = array<i64: 1, 128>}, {transform_indices = @transform_7, window_bounds = array<i64: 1, 8, 16, 8>}]} {
    %c0 = arith.constant 0 : index
    %c0_0 = arith.constant 0 : index
    %0 = vector.load %arg4[%c0, %c0_0] : memref<4x128xf32, #tpu.memory_space<vmem>>, vector<4x128xf32>
    %c0_1 = arith.constant 0 : index
    %c0_2 = arith.constant 0 : index
    %1 = vector.load %arg5[%c0_1, %c0_2] : memref<1x128xf32, #tpu.memory_space<vmem>>, vector<1x128xf32>
    %c0_3 = arith.constant 0 : index
    %c0_4 = arith.constant 0 : index
    %c0_5 = arith.constant 0 : index
    %c0_6 = arith.constant 0 : index
    %2 = vector.load %arg2[%c0_3, %c0_4, %c0_5, %c0_6] : memref<1x8x16x4xf32, #tpu.memory_space<vmem>>, vector<1x8x16x4xf32>
    %3 = vector.shape_cast %2 : vector<1x8x16x4xf32> to vector<8x16x4xf32>
    %4 = vector.shape_cast %3 : vector<8x16x4xf32> to vector<128x4xf32>
    %cst = arith.constant dense<0.000000e+00> : vector<128x128xf32>
    %5 = tpu.matmul %4, %0, %cst {dimension_numbers = #tpu.dot_dimension_numbers<[1], [0], [0], [1], [0, 0, 1, 1], [], []>} : vector<128x4xf32>, vector<4x128xf32>, vector<128x128xf32> -> vector<128x128xf32>
    %6 = vector.broadcast %1 : vector<1x128xf32> to vector<128x128xf32>
    %7 = arith.addf %5, %6 : vector<128x128xf32>
    %c0_7 = arith.constant 0 : index
    %c0_8 = arith.constant 0 : index
    %c0_9 = arith.constant 0 : index
    %c0_10 = arith.constant 0 : index
    %8 = vector.load %arg3[%c0_7, %c0_8, %c0_9, %c0_10] : memref<1x2x16x4xf32, #tpu.memory_space<vmem>>, vector<1x2x16x4xf32>
    %9 = vector.shape_cast %8 : vector<1x2x16x4xf32> to vector<2x16x4xf32>
    %10 = vector.shape_cast %9 : vector<2x16x4xf32> to vector<32x4xf32>
    %cst_11 = arith.constant dense<0.000000e+00> : vector<32x128xf32>
    %11 = tpu.matmul %10, %0, %cst_11 {dimension_numbers = #tpu.dot_dimension_numbers<[1], [0], [0], [1], [0, 0, 1, 1], [], []>} : vector<32x4xf32>, vector<4x128xf32>, vector<32x128xf32> -> vector<32x128xf32>
    %12 = vector.broadcast %1 : vector<1x128xf32> to vector<32x128xf32>
    %13 = arith.addf %11, %12 : vector<32x128xf32>
    %14 = vector.shape_cast %13 : vector<32x128xf32> to vector<2x16x128xf32>
    %cst_12 = arith.constant 0.000000e+00 : f32
    %15 = vector.broadcast %cst_12 : f32 to vector<10x1x128xf32>
    %c0_13 = arith.constant 0 : index
    %c0_14 = arith.constant 0 : index
    %c0_15 = arith.constant 0 : index
    %16 = vector.load %arg10[%c0_13, %c0_14, %c0_15] : memref<10x18x128xf32, #tpu.memory_space<vmem>>, vector<10x1x128xf32>
    tpu.vector_store %arg10[%c0_13, %c0_14, %c0_15], %15 {strides = array<i32>} : memref<10x18x128xf32, #tpu.memory_space<vmem>>, vector<10x1x128xf32>,
    %cst_16 = arith.constant 0.000000e+00 : f32
    %17 = vector.broadcast %cst_16 : f32 to vector<10x1x128xf32>
    %c0_17 = arith.constant 0 : index
    %c17 = arith.constant 17 : index
    %c0_18 = arith.constant 0 : index
    %18 = vector.load %arg10[%c0_17, %c17, %c0_18] : memref<10x18x128xf32, #tpu.memory_space<vmem>>, vector<10x1x128xf32>
    tpu.vector_store %arg10[%c0_17, %c17, %c0_18], %17 {strides = array<i32>} : memref<10x18x128xf32, #tpu.memory_space<vmem>>, vector<10x1x128xf32>,
    %19 = vector.shape_cast %7 : vector<128x128xf32> to vector<8x16x128xf32>
    %c1 = arith.constant 1 : index
    %c1_19 = arith.constant 1 : index
    %c0_20 = arith.constant 0 : index
    %20 = vector.load %arg10[%c1, %c1_19, %c0_20] : memref<10x18x128xf32, #tpu.memory_space<vmem>>, vector<8x16x128xf32>
    tpu.vector_store %arg10[%c1, %c1_19, %c0_20], %19 {strides = array<i32>} : memref<10x18x128xf32, #tpu.memory_space<vmem>>, vector<8x16x128xf32>,
    %21 = vector.extract_strided_slice %14 {offsets = [0, 0, 0], sizes = [1, 16, 128], strides = [1, 1, 1]} : vector<2x16x128xf32> to vector<1x16x128xf32>
    %c0_21 = arith.constant 0 : index
    %c1_22 = arith.constant 1 : index
    %c0_23 = arith.constant 0 : index
    %22 = vector.load %arg10[%c0_21, %c1_22, %c0_23] : memref<10x18x128xf32, #tpu.memory_space<vmem>>, vector<1x16x128xf32>
    tpu.vector_store %arg10[%c0_21, %c1_22, %c0_23], %21 {strides = array<i32>} : memref<10x18x128xf32, #tpu.memory_space<vmem>>, vector<1x16x128xf32>,
    %23 = vector.extract_strided_slice %14 {offsets = [1, 0, 0], sizes = [1, 16, 128], strides = [1, 1, 1]} : vector<2x16x128xf32> to vector<1x16x128xf32>
    %c9 = arith.constant 9 : index
    %c1_24 = arith.constant 1 : index
    %c0_25 = arith.constant 0 : index
    %24 = vector.load %arg10[%c9, %c1_24, %c0_25] : memref<10x18x128xf32, #tpu.memory_space<vmem>>, vector<1x16x128xf32>
    tpu.vector_store %arg10[%c9, %c1_24, %c0_25], %23 {strides = array<i32>} : memref<10x18x128xf32, #tpu.memory_space<vmem>>, vector<1x16x128xf32>,
    %c0_i32 = arith.constant 0 : i32
    %25 = arith.cmpi eq, %arg1, %c0_i32 : i32
    %26 = arith.extui %25 : i1 to i32
    %c0_i32_26 = arith.constant 0 : i32
    %27 = arith.cmpi ne, %26, %c0_i32_26 : i32
    scf.if %27 {
      %cst_67 = arith.constant 0.000000e+00 : f32
      %109 = vector.broadcast %cst_67 : f32 to vector<1x18x128xf32>
      %c0_68 = arith.constant 0 : index
      %c0_69 = arith.constant 0 : index
      %c0_70 = arith.constant 0 : index
      %110 = vector.load %arg10[%c0_68, %c0_69, %c0_70] : memref<10x18x128xf32, #tpu.memory_space<vmem>>, vector<1x18x128xf32>
      tpu.vector_store %arg10[%c0_68, %c0_69, %c0_70], %109 {strides = array<i32>} : memref<10x18x128xf32, #tpu.memory_space<vmem>>, vector<1x18x128xf32>,
    } else {
    }
    %c1_i32 = arith.constant 1 : i32
    %28 = arith.cmpi eq, %arg1, %c1_i32 : i32
    %29 = arith.extui %28 : i1 to i32
    %c0_i32_27 = arith.constant 0 : i32
    %30 = arith.cmpi ne, %29, %c0_i32_27 : i32
    scf.if %30 {
      %cst_67 = arith.constant 0.000000e+00 : f32
      %109 = vector.broadcast %cst_67 : f32 to vector<1x18x128xf32>
      %c9_68 = arith.constant 9 : index
      %c0_69 = arith.constant 0 : index
      %c0_70 = arith.constant 0 : index
      %110 = vector.load %arg10[%c9_68, %c0_69, %c0_70] : memref<10x18x128xf32, #tpu.memory_space<vmem>>, vector<1x18x128xf32>
      tpu.vector_store %arg10[%c9_68, %c0_69, %c0_70], %109 {strides = array<i32>} : memref<10x18x128xf32, #tpu.memory_space<vmem>>, vector<1x18x128xf32>,
    } else {
    }
    %c0_28 = arith.constant 0 : index
    %c0_29 = arith.constant 0 : index
    %31 = vector.load %arg6[%c0_28, %c0_29] : memref<9x128xf32, #tpu.memory_space<vmem>>, vector<9x128xf32>
    %cst_30 = arith.constant 0.000000e+00 : f32
    %32 = vector.broadcast %cst_30 : f32 to vector<8x16x128xf32>
    %c0_31 = arith.constant 0 : index
    %c0_32 = arith.constant 0 : index
    %c0_33 = arith.constant 0 : index
    %33 = vector.load %arg10[%c0_31, %c0_32, %c0_33] : memref<10x18x128xf32, #tpu.memory_space<vmem>>, vector<8x16x128xf32>
    %34 = vector.extract_strided_slice %31 {offsets = [0, 0], sizes = [1, 128], strides = [1, 1]} : vector<9x128xf32> to vector<1x128xf32>
    %35 = vector.shape_cast %34 : vector<1x128xf32> to vector<128xf32>
    %36 = vector.shape_cast %35 : vector<128xf32> to vector<1x1x128xf32>
    %37 = vector.broadcast %36 : vector<1x1x128xf32> to vector<8x16x128xf32>
    %38 = arith.mulf %33, %37 : vector<8x16x128xf32>
    %39 = arith.addf %32, %38 : vector<8x16x128xf32>
    %c0_34 = arith.constant 0 : index
    %c1_35 = arith.constant 1 : index
    %c0_36 = arith.constant 0 : index
    %40 = vector.load %arg10[%c0_34, %c1_35, %c0_36] : memref<10x18x128xf32, #tpu.memory_space<vmem>>, vector<8x16x128xf32>
    %41 = vector.extract_strided_slice %31 {offsets = [1, 0], sizes = [1, 128], strides = [1, 1]} : vector<9x128xf32> to vector<1x128xf32>
    %42 = vector.shape_cast %41 : vector<1x128xf32> to vector<128xf32>
    %43 = vector.shape_cast %42 : vector<128xf32> to vector<1x1x128xf32>
    %44 = vector.broadcast %43 : vector<1x1x128xf32> to vector<8x16x128xf32>
    %45 = arith.mulf %40, %44 : vector<8x16x128xf32>
    %46 = arith.addf %39, %45 : vector<8x16x128xf32>
    %c0_37 = arith.constant 0 : index
    %c2 = arith.constant 2 : index
    %c0_38 = arith.constant 0 : index
    %47 = vector.load %arg10[%c0_37, %c2, %c0_38] : memref<10x18x128xf32, #tpu.memory_space<vmem>>, vector<8x16x128xf32>
    %48 = vector.extract_strided_slice %31 {offsets = [2, 0], sizes = [1, 128], strides = [1, 1]} : vector<9x128xf32> to vector<1x128xf32>
    %49 = vector.shape_cast %48 : vector<1x128xf32> to vector<128xf32>
    %50 = vector.shape_cast %49 : vector<128xf32> to vector<1x1x128xf32>
    %51 = vector.broadcast %50 : vector<1x1x128xf32> to vector<8x16x128xf32>
    %52 = arith.mulf %47, %51 : vector<8x16x128xf32>
    %53 = arith.addf %46, %52 : vector<8x16x128xf32>
    %c1_39 = arith.constant 1 : index
    %c0_40 = arith.constant 0 : index
    %c0_41 = arith.constant 0 : index
    %54 = vector.load %arg10[%c1_39, %c0_40, %c0_41] : memref<10x18x128xf32, #tpu.memory_space<vmem>>, vector<8x16x128xf32>
    %55 = vector.extract_strided_slice %31 {offsets = [3, 0], sizes = [1, 128], strides = [1, 1]} : vector<9x128xf32> to vector<1x128xf32>
    %56 = vector.shape_cast %55 : vector<1x128xf32> to vector<128xf32>
    %57 = vector.shape_cast %56 : vector<128xf32> to vector<1x1x128xf32>
    %58 = vector.broadcast %57 : vector<1x1x128xf32> to vector<8x16x128xf32>
    %59 = arith.mulf %54, %58 : vector<8x16x128xf32>
    %60 = arith.addf %53, %59 : vector<8x16x128xf32>
    %c1_42 = arith.constant 1 : index
    %c1_43 = arith.constant 1 : index
    %c0_44 = arith.constant 0 : index
    %61 = vector.load %arg10[%c1_42, %c1_43, %c0_44] : memref<10x18x128xf32, #tpu.memory_space<vmem>>, vector<8x16x128xf32>
    %62 = vector.extract_strided_slice %31 {offsets = [4, 0], sizes = [1, 128], strides = [1, 1]} : vector<9x128xf32> to vector<1x128xf32>
    %63 = vector.shape_cast %62 : vector<1x128xf32> to vector<128xf32>
    %64 = vector.shape_cast %63 : vector<128xf32> to vector<1x1x128xf32>
    %65 = vector.broadcast %64 : vector<1x1x128xf32> to vector<8x16x128xf32>
    %66 = arith.mulf %61, %65 : vector<8x16x128xf32>
    %67 = arith.addf %60, %66 : vector<8x16x128xf32>
    %c1_45 = arith.constant 1 : index
    %c2_46 = arith.constant 2 : index
    %c0_47 = arith.constant 0 : index
    %68 = vector.load %arg10[%c1_45, %c2_46, %c0_47] : memref<10x18x128xf32, #tpu.memory_space<vmem>>, vector<8x16x128xf32>
    %69 = vector.extract_strided_slice %31 {offsets = [5, 0], sizes = [1, 128], strides = [1, 1]} : vector<9x128xf32> to vector<1x128xf32>
    %70 = vector.shape_cast %69 : vector<1x128xf32> to vector<128xf32>
    %71 = vector.shape_cast %70 : vector<128xf32> to vector<1x1x128xf32>
    %72 = vector.broadcast %71 : vector<1x1x128xf32> to vector<8x16x128xf32>
    %73 = arith.mulf %68, %72 : vector<8x16x128xf32>
    %74 = arith.addf %67, %73 : vector<8x16x128xf32>
    %c2_48 = arith.constant 2 : index
    %c0_49 = arith.constant 0 : index
    %c0_50 = arith.constant 0 : index
    %75 = vector.load %arg10[%c2_48, %c0_49, %c0_50] : memref<10x18x128xf32, #tpu.memory_space<vmem>>, vector<8x16x128xf32>
    %76 = vector.extract_strided_slice %31 {offsets = [6, 0], sizes = [1, 128], strides = [1, 1]} : vector<9x128xf32> to vector<1x128xf32>
    %77 = vector.shape_cast %76 : vector<1x128xf32> to vector<128xf32>
    %78 = vector.shape_cast %77 : vector<128xf32> to vector<1x1x128xf32>
    %79 = vector.broadcast %78 : vector<1x1x128xf32> to vector<8x16x128xf32>
    %80 = arith.mulf %75, %79 : vector<8x16x128xf32>
    %81 = arith.addf %74, %80 : vector<8x16x128xf32>
    %c2_51 = arith.constant 2 : index
    %c1_52 = arith.constant 1 : index
    %c0_53 = arith.constant 0 : index
    %82 = vector.load %arg10[%c2_51, %c1_52, %c0_53] : memref<10x18x128xf32, #tpu.memory_space<vmem>>, vector<8x16x128xf32>
    %83 = vector.extract_strided_slice %31 {offsets = [7, 0], sizes = [1, 128], strides = [1, 1]} : vector<9x128xf32> to vector<1x128xf32>
    %84 = vector.shape_cast %83 : vector<1x128xf32> to vector<128xf32>
    %85 = vector.shape_cast %84 : vector<128xf32> to vector<1x1x128xf32>
    %86 = vector.broadcast %85 : vector<1x1x128xf32> to vector<8x16x128xf32>
    %87 = arith.mulf %82, %86 : vector<8x16x128xf32>
    %88 = arith.addf %81, %87 : vector<8x16x128xf32>
    %c2_54 = arith.constant 2 : index
    %c2_55 = arith.constant 2 : index
    %c0_56 = arith.constant 0 : index
    %89 = vector.load %arg10[%c2_54, %c2_55, %c0_56] : memref<10x18x128xf32, #tpu.memory_space<vmem>>, vector<8x16x128xf32>
    %90 = vector.extract_strided_slice %31 {offsets = [8, 0], sizes = [1, 128], strides = [1, 1]} : vector<9x128xf32> to vector<1x128xf32>
    %91 = vector.shape_cast %90 : vector<1x128xf32> to vector<128xf32>
    %92 = vector.shape_cast %91 : vector<128xf32> to vector<1x1x128xf32>
    %93 = vector.broadcast %92 : vector<1x1x128xf32> to vector<8x16x128xf32>
    %94 = arith.mulf %89, %93 : vector<8x16x128xf32>
    %95 = arith.addf %88, %94 : vector<8x16x128xf32>
    %96 = vector.shape_cast %95 : vector<8x16x128xf32> to vector<128x128xf32>
    %c0_57 = arith.constant 0 : index
    %c0_58 = arith.constant 0 : index
    %97 = vector.load %arg7[%c0_57, %c0_58] : memref<128x128xf32, #tpu.memory_space<vmem>>, vector<128x128xf32>
    %cst_59 = arith.constant dense<0.000000e+00> : vector<128x128xf32>
    %98 = tpu.matmul %96, %97, %cst_59 {dimension_numbers = #tpu.dot_dimension_numbers<[1], [0], [0], [1], [0, 0, 1, 1], [], []>} : vector<128x128xf32>, vector<128x128xf32>, vector<128x128xf32> -> vector<128x128xf32>
    %c0_60 = arith.constant 0 : index
    %c0_61 = arith.constant 0 : index
    %99 = vector.load %arg8[%c0_60, %c0_61] : memref<1x128xf32, #tpu.memory_space<vmem>>, vector<1x128xf32>
    %100 = vector.broadcast %99 : vector<1x128xf32> to vector<128x128xf32>
    %101 = arith.addf %98, %100 : vector<128x128xf32>
    %cst_62 = arith.constant 0.000000e+00 : f32
    %102 = vector.broadcast %cst_62 : f32 to vector<128x128xf32>
    %103 = arith.maximumf %101, %102 : vector<128x128xf32>
    %104 = vector.shape_cast %103 : vector<128x128xf32> to vector<8x16x128xf32>
    %105 = vector.extract_strided_slice %104 {offsets = [0, 0, 0], sizes = [8, 16, 8], strides = [1, 1, 1]} : vector<8x16x128xf32> to vector<8x16x8xf32>
    %c0_63 = arith.constant 0 : index
    %c0_64 = arith.constant 0 : index
    %c0_65 = arith.constant 0 : index
    %c0_66 = arith.constant 0 : index
    %106 = vector.load %arg9[%c0_63, %c0_64, %c0_65, %c0_66] : memref<1x8x16x8xf32, #tpu.memory_space<vmem>>, vector<1x8x16x8xf32>
    %107 = vector.shape_cast %106 : vector<1x8x16x8xf32> to vector<8x16x8xf32>
    %108 = vector.shape_cast %105 : vector<8x16x8xf32> to vector<1x8x16x8xf32>
    tpu.vector_store %arg9[%c0_63, %c0_64, %c0_65, %c0_66], %108 {strides = array<i32>} : memref<1x8x16x8xf32, #tpu.memory_space<vmem>>, vector<1x8x16x8xf32>,
    return
  }
  func.func @transform_0(%arg0: i32, %arg1: i32) -> (i32, i32, i32, i32) {
    %c0_i32 = arith.constant 0 : i32
    %c0_i32_0 = arith.constant 0 : i32
    %c0_i32_1 = arith.constant 0 : i32
    return %arg0, %arg1, %c0_i32, %c0_i32_0 : i32, i32, i32, i32
  }
  func.func @transform_1(%arg0: i32, %arg1: i32) -> (i32, i32, i32, i32) {
    %c0_i32 = arith.constant 0 : i32
    %c0_i32_0 = arith.constant 0 : i32
    %c0_i32_1 = arith.constant 0 : i32
    return %arg0, %arg1, %c0_i32, %c0_i32_0 : i32, i32, i32, i32
  }
  func.func @transform_2(%arg0: i32, %arg1: i32) -> (i32, i32) {
    %c0_i32 = arith.constant 0 : i32
    %c0_i32_0 = arith.constant 0 : i32
    %c0_i32_1 = arith.constant 0 : i32
    return %c0_i32, %c0_i32_0 : i32, i32
  }
  func.func @transform_3(%arg0: i32, %arg1: i32) -> (i32, i32) {
    %c0_i32 = arith.constant 0 : i32
    %c0_i32_0 = arith.constant 0 : i32
    %c0_i32_1 = arith.constant 0 : i32
    return %c0_i32, %c0_i32_0 : i32, i32
  }
  func.func @transform_4(%arg0: i32, %arg1: i32) -> (i32, i32) {
    %c0_i32 = arith.constant 0 : i32
    %c0_i32_0 = arith.constant 0 : i32
    %c0_i32_1 = arith.constant 0 : i32
    return %c0_i32, %c0_i32_0 : i32, i32
  }
  func.func @transform_5(%arg0: i32, %arg1: i32) -> (i32, i32) {
    %c0_i32 = arith.constant 0 : i32
    %c0_i32_0 = arith.constant 0 : i32
    %c0_i32_1 = arith.constant 0 : i32
    return %c0_i32, %c0_i32_0 : i32, i32
  }
  func.func @transform_6(%arg0: i32, %arg1: i32) -> (i32, i32) {
    %c0_i32 = arith.constant 0 : i32
    %c0_i32_0 = arith.constant 0 : i32
    %c0_i32_1 = arith.constant 0 : i32
    return %c0_i32, %c0_i32_0 : i32, i32
  }
  func.func @transform_7(%arg0: i32, %arg1: i32) -> (i32, i32, i32, i32) {
    %c0_i32 = arith.constant 0 : i32
    %c0_i32_0 = arith.constant 0 : i32
    %c0_i32_1 = arith.constant 0 : i32
    return %arg0, %arg1, %c0_i32, %c0_i32_0 : i32, i32, i32, i32
  }
}

</mosaic_0001>

<bundles_post_ra>
// kernel: tpu_custom_call.1
= control target key start
LH: loop header
LB: loop body
LE: loop exit
PB: predicated region body
PF: predicated region fallthrough
CT: control target
= control target key end

     0   :  { %s1881_s24 = smov 0   ;;  %s1883_s25 = smov 0   ;;  %s2449_s0 = inlined_call_operand.vmem [shape: f32[2,16,16,4], index: 0, kind: input, shape index: {}]   ;;  %s2450_s1 = inlined_call_operand.vmem [shape: f32[2,4,16,4], index: 1, kind: input, shape index: {}]   ;;  %s2451_s2 = inlined_call_operand.vmem [shape: f32[4,128], index: 2, kind: input, shape index: {}]   ;;  %s2452_s3 = inlined_call_operand.vmem [shape: f32[1,128], index: 3, kind: input, shape index: {}]   ;;  %s2453_s4 = inlined_call_operand.vmem [shape: f32[9,128], index: 4, kind: input, shape index: {}]   ;;  %s2454_s5 = inlined_call_operand.vmem [shape: f32[128,128], index: 5, kind: input, shape index: {}]   ;;  %s2455_s6 = inlined_call_operand.vmem [shape: f32[1,128], index: 6, kind: input, shape index: {}]   ;;  %s2456_s7 = inlined_call_operand.vmem [shape: f32[2,16,16,8], index: 7, kind: output, shape index: {}]  }
   0x1   :  { %s1885_s26 = smov 0   ;;  %s1887_s27 = smov 0  }
   0x2   :  { %s1889_s28 = smov 0  }
   0x3 LB: > { %s26_s29 = sadd.s32 1, %s1828_s26  ;;  %s29_s30 = sadd.s32 1, %s1832_s27  ;;  %s1836_s28 = sphi %s1889_s28, %s17_s28   ;;  %s1832_s27 = sphi %s1887_s27, %s2460_s27   ;;  %s1828_s26 = sphi %s1885_s26, %s2459_s26   ;;  %s1824_s25 = sphi %s1883_s25, %s2458_s25   ;;  %s1820_s24 = sphi %s1881_s24, %s2457_s24  }
   0x4   : > { %p27_p0 = scmp.ge.s32.totalorder %s26_s29, 2  ;;  %p1537_p1 = scmp.ge.s32.totalorder %s1836_s28, 1 }
   0x5   : > { %p277_p2 = scmp.lt.s32.totalorder %s1836_s28, 5 }
   0x6   : > { %s2462_s29 = smov (%p27_p0, %s26_s29), 0  ;;  %s2464_s30 = smov (!%p27_p0, %s29_s30), %s1832_s27 }
   0x7   : > { %p278_p3 = pnand %p1537_p1, %p277_p2  ;;  %p31_p4 = scmp.ge.s32.totalorder %s2464_s30, 2 }
   0x8   : > { %s1538_s10 = sshll.u32 (!%p278_p3), %s1820_s24, 3  ;;  %p330_p5 = scmp.lt.s32.totalorder (!%p278_p3), %s1824_s25, 1 }
   0x9   : > { %s2466_s30 = smov (%p31_p4, %s2464_s30), 0  ;;  %281 = sbr.rel (%p278_p3) target bundleno = 552 (0x228), region = 48 }
   0xa   : > { %p332_p6 = scmp.lt.s32.totalorder (!%p278_p3), %s1538_s10, 15  ;;  %s1542_s11 = sshll.u32 (!%p278_p3), %s1820_s24, 1 }
   0xb   : > { %p343_p7 = scmp.lt.s32.totalorder (!%p278_p3), %s1542_s11, 3  ;;  %p1573_p8 = scmp.ne.s32.totalorder (!%p278_p3), %s1820_s24, 0 }
   0xe   : > { %v362_v0 = vld [vmem:[%s2451_s2] sm:$0xf]  ;;  %vm435_vm0 = vcmask 1043456   ;;  %s2468_s25 = smov (!%p330_p5, %s1824_s25), 1  ;;  %s2470_s10 = smov (!%p332_p6, %s1538_s10), 15  ;;  %vm386_vm1 = vcmask 31744  }
   0xf   : > { %1633 = vmatprep.subr.msk.mxu0 %vm435_vm0, %v362_v0  ;;  %1659 = vmatprep.subr.msk.mxu1 %vm435_vm0, %v362_v0  ;;  %s1540_s12 = sshll.u32 %s2468_s25, 5  ;;  %s1539_s13 = sshll.u32 %s2470_s10, 1  ;;  %v1838_v21 = vmov 0.0   ;;  %v1550_v22 = vld [vmem:[%s2452_s3] ss:$0 sm:$0xff] }
  0x10   : > { %1634 = vmatpush3.msk.msra.mxu0 %vm435_vm0, %v362_v0  ;;  %1660 = vmatpush3.msk.msra.mxu1 %vm435_vm0, %v362_v0  ;;  %s336_s14 = sadd.s32 %s1540_s12, %s1539_s13  ;;  %s1544_s16 = sshll.u32 %s2468_s25, 3  ;;  %685 = vst [vmem:[#allocation2] sm:$0x1] %v1838_v21  ;;  %686 = vst [vmem:[#allocation2 + $0x18] sm:$0x1] %v1838_v21 }
  0x11   : > { %s1541_s15 = sshll.u32 %s336_s14, 3  ;;  %s2472_s11 = smov (!%p343_p7, %s1542_s11), 3  ;;  %687 = vst [vmem:[#allocation2 + $0x30] sm:$0x1] %v1838_v21  ;;  %688 = vst [vmem:[#allocation2 + $0x48] sm:$0x1] %v1838_v21 }
  0x12   : > { %s1921_s19 = scalar_lea.vmem %s2449_s0, %s1541_s15  ;;  %s1926_s22 = scalar_lea.vmem %s2456_s7, %s1541_s15  ;;  %689 = vst [vmem:[#allocation2 + $0x60] sm:$0x1] %v1838_v21  ;;  %690 = vst [vmem:[#allocation2 + $0x78] sm:$0x1] %v1838_v21 }
  0x13   : > { %v364_v1 = vld [vmem:[%s1921_s19] sm:$0xff]  ;;  %v365_v2 = vld [vmem:[%s1921_s19 + $0x8] sm:$0xff]  ;;  %v366_v3 = vld [vmem:[%s1921_s19 + $0x10] sm:$0xff]  ;;  %s1543_s23 = sshll.u32 %s2472_s11, 1  ;;  %691 = vst [vmem:[#allocation2 + $0x90] sm:$0x1] %v1838_v21 }
  0x14   : > { %1635 = vmatprep.mubr.msk.f32.mxu0 %vm386_vm1, %v364_v1  ;;  %v367_v4 = vld [vmem:[%s1921_s19 + $0x18] sm:$0xff]  ;;  %s347_s25 = sadd.s32 %s1544_s16, %s1543_s23  ;;  %v368_v5 = vld [vmem:[%s1921_s19 + $0x20] sm:$0xff]  ;;  %v369_v9 = vld [vmem:[%s1921_s19 + $0x28] sm:$0xff]  ;;  %692 = vst [vmem:[#allocation2 + $0xa8] sm:$0x1] %v1838_v21 }
  0x15   : > { %1636 = vmatmul.mubr.msk.f32.vlgmr.msra.gmra.mxu0 %vm386_vm1, %v365_v2  ;;  %s1545_s8 = sshll.u32 %s347_s25, 3  ;;  %v370_v10 = vld [vmem:[%s1921_s19 + $0x30] sm:$0xff]  ;;  %v371_v12 = vld [vmem:[%s1921_s19 + $0x38] sm:$0xff]  ;;  %v372_v13 = vld [vmem:[%s1921_s19 + $0x40] sm:$0xff]  ;;  %693 = vst [vmem:[#allocation2 + $0xc0] sm:$0x1] %v1838_v21 }
  0x16   : > { %1638 = vmatprep.mubr.msk.f32.mxu0 %vm386_vm1, %v366_v3  ;;  %s349_s12 = scalar_lea.vmem %s2450_s1, %s1545_s8  ;;  %v373_v14 = vld [vmem:[%s1921_s19 + $0x48] sm:$0xff]  ;;  %v374_v15 = vld [vmem:[%s1921_s19 + $0x50] sm:$0xff]  ;;  %v375_v16 = vld [vmem:[%s1921_s19 + $0x58] sm:$0xff]  ;;  %694 = vst [vmem:[#allocation2 + $0xd8] sm:$0x1] %v1838_v21 }
  0x17   : > { %v584_v6 = vld [vmem:[%s349_s12] sm:$0xff]  ;;  %v585_v7 = vld [vmem:[%s349_s12 + $0x8] sm:$0xff]  ;;  %v586_v8 = vld [vmem:[%s349_s12 + $0x10] sm:$0xff]  ;;  %695 = vst [vmem:[#allocation2 + $0x11] sm:$0x1] %v1838_v21 }
  0x18   : > { %1661 = vmatprep.mubr.msk.f32.mxu1 %vm386_vm1, %v584_v6  ;;  %v587_v11 = vld [vmem:[%s349_s12 + $0x18] sm:$0xff]  ;;  %v376_v17 = vld [vmem:[%s1921_s19 + $0x60] sm:$0xff]  ;;  %v377_v18 = vld [vmem:[%s1921_s19 + $0x68] sm:$0xff]  ;;  %696 = vst [vmem:[#allocation2 + $0x29] sm:$0x1] %v1838_v21 }
  0x19   : > { %1639 = vmatmul.mubr.msk.f32.gmra.mxu0 %vm386_vm1, %v367_v4  ;;  %1662 = vmatmul.mubr.msk.f32.vlgmr.msra.gmra.mxu1 %vm386_vm1, %v585_v7  ;;  %v378_v19 = vld [vmem:[%s1921_s19 + $0x70] sm:$0xff]  ;;  %v379_v20 = vld [vmem:[%s1921_s19 + $0x78] sm:$0xff]  ;;  %697 = vst [vmem:[#allocation2 + $0x41] sm:$0x1] %v1838_v21  ;;  %698 = vst [vmem:[#allocation2 + $0x59] sm:$0x1] %v1838_v21 }
  0x1a   : > { %1641 = vmatprep.mubr.msk.f32.mxu0 %vm386_vm1, %v368_v5  ;;  %1664 = vmatprep.mubr.msk.f32.mxu1 %vm386_vm1, %v586_v8  ;;  %699 = vst [vmem:[#allocation2 + $0x71] sm:$0x1] %v1838_v21  ;;  %700 = vst [vmem:[#allocation2 + $0x89] sm:$0x1] %v1838_v21 }
  0x1b   : > { %701 = vst [vmem:[#allocation2 + $0xa1] sm:$0x1] %v1838_v21  ;;  %702 = vst [vmem:[#allocation2 + $0xb9] sm:$0x1] %v1838_v21 }
  0x1c   : > { %703 = vst [vmem:[#allocation2 + $0xd1] sm:$0x1] %v1838_v21  ;;  %704 = vst [vmem:[#allocation2 + $0xe9] sm:$0x1] %v1838_v21 }
  0x1d   : > { %1642 = vmatmul.mubr.msk.f32.gmra.mxu0 %vm386_vm1, %v369_v9  ;;  %1665 = vmatmul.mubr.msk.f32.gmra.mxu1 %vm386_vm1, %v587_v11 }
  0x1e   : > { %1644 = vmatprep.mubr.msk.f32.mxu0 %vm386_vm1, %v370_v10 }
  0x21   : > { %1645 = vmatmul.mubr.msk.f32.gmra.mxu0 %vm386_vm1, %v371_v12 }
  0x22   : > { %1647 = vmatprep.mubr.msk.f32.mxu0 %vm386_vm1, %v372_v13 }
  0x25   : > { %1648 = vmatmul.mubr.msk.f32.gmra.mxu0 %vm386_vm1, %v373_v14 }
  0x26   : > { %1650 = vmatprep.mubr.msk.f32.mxu0 %vm386_vm1, %v374_v15 }
  0x29   : > { %1651 = vmatmul.mubr.msk.f32.gmra.mxu0 %vm386_vm1, %v375_v16 }
  0x2a   : > { %1653 = vmatprep.mubr.msk.f32.mxu0 %vm386_vm1, %v376_v17 }
  0x2d   : > { %1654 = vmatmul.mubr.msk.f32.gmra.mxu0 %vm386_vm1, %v377_v18 }
  0x2e   : > { %1656 = vmatprep.mubr.msk.f32.mxu0 %vm386_vm1, %v378_v19 }
  0x31   : > { %1657 = vmatmul.mubr.msk.f32.gmra.mxu0 %vm386_vm1, %v379_v20 }
  0xd5   : > { %v1637_v23 = vpop.f32.mrf.mxu0 }
  0xd6   : > { %v511_v24 = vadd.f32 %v1637_v23, %v1550_v22 }
  0xd7   : > { %v505_v25 = vpop.f32.mrf.mxu0 }
  0xd8   : > { %707 = vst [vmem:[#allocation2 + $0x21] sm:$0xff] %v511_v24  ;;  %v506_v26 = vadd.f32 %v1550_v22, %v505_v25 }
  0xd9   : > { %v1640_v27 = vpop.f32.mrf.mxu0  ;;  %v1663_v30 = vpop.f32.mrf.mxu1 }
  0xda   : > { %706 = vst [vmem:[#allocation2 + $0x19] sm:$0xff] %v506_v26  ;;  %v521_v28 = vadd.f32 %v1640_v27, %v1550_v22  ;;  %v672_v32 = vadd.f32 %v1663_v30, %v1550_v22 }
  0xdb   : > { %v515_v29 = vpop.f32.mrf.mxu0  ;;  %v666_v34 = vpop.f32.mrf.mxu1 }
  0xdc   : > { %709 = vst [vmem:[#allocation2 + $0x39] sm:$0xff] %v521_v28  ;;  %v516_v31 = vadd.f32 %v1550_v22, %v515_v29  ;;  %723 = vst [vmem:[#allocation2 + $0x9] sm:$0xff] %v672_v32  ;;  %v667_v36 = vadd.f32 %v1550_v22, %v666_v34 }
  0xdd   : > { %v1643_v33 = vpop.f32.mrf.mxu0  ;;  %v1666_v38 = vpop.f32.mrf.mxu1 }
  0xde   : > { %708 = vst [vmem:[#allocation2 + $0x31] sm:$0xff] %v516_v31  ;;  %v531_v35 = vadd.f32 %v1643_v33, %v1550_v22  ;;  %722 = vst [vmem:[#allocation2 + $0x1] sm:$0xff] %v667_v36  ;;  %v682_v40 = vadd.f32 %v1666_v38, %v1550_v22 }
  0xdf   : > { %v525_v37 = vpop.f32.mrf.mxu0  ;;  %v676_v42 = vpop.f32.mrf.mxu1 }
  0xe0   : > { %711 = vst [vmem:[#allocation2 + $0x51] sm:$0xff] %v531_v35  ;;  %v526_v39 = vadd.f32 %v1550_v22, %v525_v37  ;;  %726 = vst [vmem:[#allocation2 + $0xe1] sm:$0xff] %v682_v40  ;;  %v677_v44 = vadd.f32 %v1550_v22, %v676_v42 }
  0xe1   : > { %v1646_v41 = vpop.f32.mrf.mxu0 }
  0xe2   : > { %710 = vst [vmem:[#allocation2 + $0x49] sm:$0xff] %v526_v39  ;;  %v541_v43 = vadd.f32 %v1646_v41, %v1550_v22  ;;  %725 = vst [vmem:[#allocation2 + $0xd9] sm:$0xff] %v677_v44 }
  0xe3   : > { %v535_v45 = vpop.f32.mrf.mxu0 }
  0xe4   : > { %713 = vst [vmem:[#allocation2 + $0x69] sm:$0xff] %v541_v43  ;;  %v536_v46 = vadd.f32 %v1550_v22, %v535_v45 }
  0xe5   : > { %v1649_v47 = vpop.f32.mrf.mxu0 }
  0xe6   : > { %712 = vst [vmem:[#allocation2 + $0x61] sm:$0xff] %v536_v46  ;;  %v551_v48 = vadd.f32 %v1649_v47, %v1550_v22 }
  0xe7   : > { %v545_v49 = vpop.f32.mrf.mxu0 }
  0xe8   : > { %715 = vst [vmem:[#allocation2 + $0x81] sm:$0xff] %v551_v48  ;;  %v546_v50 = vadd.f32 %v1550_v22, %v545_v49 }
  0xe9   : > { %v1652_v51 = vpop.f32.mrf.mxu0 }
  0xea   : > { %714 = vst [vmem:[#allocation2 + $0x79] sm:$0xff] %v546_v50  ;;  %v561_v52 = vadd.f32 %v1652_v51, %v1550_v22 }
  0xeb   : > { %v555_v53 = vpop.f32.mrf.mxu0 }
  0xec   : > { %717 = vst [vmem:[#allocation2 + $0x99] sm:$0xff] %v561_v52  ;;  %v556_v54 = vadd.f32 %v1550_v22, %v555_v53 }
  0xed   : > { %v1655_v55 = vpop.f32.mrf.mxu0 }
  0xee   : > { %716 = vst [vmem:[#allocation2 + $0x91] sm:$0xff] %v556_v54  ;;  %v571_v56 = vadd.f32 %v1655_v55, %v1550_v22 }
  0xef   : > { %v565_v57 = vpop.f32.mrf.mxu0 }
  0xf0   : > { %719 = vst [vmem:[#allocation2 + $0xb1] sm:$0xff] %v571_v56  ;;  %v566_v58 = vadd.f32 %v1550_v22, %v565_v57 }
  0xf1   : > { %v1658_v59 = vpop.f32.mrf.mxu0 }
  0xf2   : > { %718 = vst [vmem:[#allocation2 + $0xa9] sm:$0xff] %v566_v58  ;;  %v581_v60 = vadd.f32 %v1658_v59, %v1550_v22  ;;  %730 = sbr.rel (%p1573_p8) target bundleno = 250 (0xfa), region = 52 }
  0xf3   : > { %v575_v61 = vpop.f32.mrf.mxu0 }
  0xf4   : > { %721 = vst [vmem:[#allocation2 + $0xc9] sm:$0xff] %v581_v60  ;;  %v576_v62 = vadd.f32 %v1550_v22, %v575_v61 }
  0xf6   : > { %720 = vst [vmem:[#allocation2 + $0xc1] sm:$0xff] %v576_v62 }
  0xf7   : > { %v1839_v63 = vmov 0.0  }
  0xf8   : > { %731 = vst [vmem:[#allocation2] sm:$0xff] %v1839_v63  ;;  %732 = vst [vmem:[#allocation2 + $0x8] sm:$0xff] %v1839_v63 }
  0xf9   : > { %733 = vst [vmem:[#allocation2 + $0x10] sm:$0x3] %v1839_v63 }
  0xfa PF: > { %p1574_p9 = scmp.ne.s32.totalorder %s1820_s24, 1 }
  0xfc   : > { %737 = sbr.rel (%p1574_p9) target bundleno = 260 (0x104), region = 56 }
 0x101   : > { %v1840_v0 = vmov 0.0  }
 0x102   : > { %738 = vst [vmem:[#allocation2 + $0xd8] sm:$0xff] %v1840_v0  ;;  %739 = vst [vmem:[#allocation2 + $0xe0] sm:$0xff] %v1840_v0 }
 0x103   : > { %740 = vst [vmem:[#allocation2 + $0xe8] sm:$0x3] %v1840_v0 }
 0x104 PF: > { %v1227_v1 = vld [vmem:[%s2454_s5 + $0x78] sm:$0xff]  ;;  %v1226_v2 = vld [vmem:[%s2454_s5 + $0x70] sm:$0xff]  ;;  %v759_v3 = vlaneseq  ;;  %v1225_v4 = vld [vmem:[%s2454_s5 + $0x68] sm:$0xff]  ;;  %vm1396_vm2 = vcmask 64512  }
 0x105   : > { %1667 = vmatprep.subr.mxu0 %v1227_v1  ;;  %1723 = vmatprep.subr.mxu1 %v1227_v1  ;;  %v1224_v6 = vld [vmem:[%s2454_s5 + $0x60] sm:$0xff]  ;;  %v1223_v10 = vld [vmem:[%s2454_s5 + $0x58] sm:$0xff]  ;;  %v1222_v26 = vld [vmem:[%s2454_s5 + $0x50] sm:$0xff] }
 0x106   : > { %1668 = vmatpush3.msra.mxu0 %v1227_v1  ;;  %1739 = vmatpush3.msra.mxu1 %v1227_v1  ;;  %v760_v5 = vshrl.u32 %v759_v3, 7  ;;  %v741_v11 = vld [vmem:[%s2453_s4] sm:$0xff]  ;;  %v1996_v21 = vld [vmem:[#allocation2 + $0x18] sm:$0xff]  ;;  %v1221_v30 = vld [vmem:[%s2454_s5 + $0x48] sm:$0xff] }
 0x107   : > { %1669 = vmatprep.subr.mxu0 %v1226_v2  ;;  %1724 = vmatprep.subr.mxu1 %v1226_v2  ;;  %v743_v14 = vld [vmem:[#allocation2] sm:$0xff]  ;;  %v2020_v34 = vld [vmem:[%s2453_s4 + $0x8] ss:$0 sm:$0xff]  ;;  %v1219_v44 = vld [vmem:[%s2454_s5 + $0x38] sm:$0xff] }
 0x108   : > { %1670 = vmatpush3.msra.mxu0 %v1226_v2  ;;  %1740 = vmatpush3.msra.mxu1 %v1226_v2  ;;  %v761_v7 = vsub.s32 0, %v760_v5  ;;  %v813_v8 = vsub.s32 1, %v760_v5  ;;  %v865_v9 = vsub.s32 2, %v760_v5  ;;  %v917_v12 = vsub.s32 3, %v760_v5  ;;  %v795_v16 = vld [vmem:[#allocation2 + $0x1] sm:$0xff]  ;;  %v2033_v41 = vld [vmem:[#allocation2 + $0x19] sm:$0xff] }
 0x109   : > { %1671 = vmatprep.subr.mxu0 %v1225_v4  ;;  %1725 = vmatprep.subr.mxu1 %v1225_v4  ;;  %v969_v13 = vsub.s32 4, %v760_v5  ;;  %v847_v18 = vld [vmem:[#allocation2 + $0x2] sm:$0xff]  ;;  %v1021_v20 = vsub.s32 5, %v760_v5  ;;  %v1074_v24 = vsub.s32 6, %v760_v5  ;;  %v1126_v25 = vsub.s32 7, %v760_v5  ;;  %v2035_v42 = vld [vmem:[#allocation2 + $0x1a] sm:$0xff] }
 0x10a   : > { %1672 = vmatpush3.msra.mxu0 %v1225_v4  ;;  %1741 = vmatpush3.msra.mxu1 %v1225_v4  ;;  %v1990_v15 = vrot.slane %v741_v11, %v761_v7  ;;  %v1992_v17 = vrot.slane %v741_v11, %v813_v8  ;;  %v1994_v19 = vrot.slane %v741_v11, %v865_v9  ;;  %v2015_v33 = vld [vmem:[#allocation2 + $0x60] sm:$0xff]  ;;  %v2046_v48 = vld [vmem:[#allocation2 + $0x32] sm:$0xff]  ;;  %v744_v55 = vld [vmem:[#allocation2 + $0x8] sm:$0xff] }
 0x10b   : > { %1673 = vmatprep.subr.mxu0 %v1224_v6  ;;  %1726 = vmatprep.subr.mxu1 %v1224_v6  ;;  %v1998_v22 = vrot.slane %v741_v11, %v917_v12  ;;  %v2000_v23 = vrot.slane %v741_v11, %v969_v13  ;;  %v2013_v32 = vrot.slane %v741_v11, %v1021_v20  ;;  %v2026_v38 = vld [vmem:[#allocation2 + $0x61] sm:$0xff]  ;;  %v2048_v49 = vld [vmem:[#allocation2 + $0x78] sm:$0xff]  ;;  %v2050_v50 = vld [vmem:[#allocation2 + $0x30] sm:$0xff] }
 0x10c   : > { %1674 = vmatpush3.msra.mxu0 %v1224_v6  ;;  %1742 = vmatpush3.msra.mxu1 %v1224_v6  ;;  %v763_v27 = vmul.f32 %v1990_v15, %v743_v14  ;;  %v815_v28 = vmul.f32 %v1992_v17, %v795_v16  ;;  %v867_v29 = vmul.f32 %v1994_v19, %v847_v18  ;;  %v2028_v39 = vld [vmem:[#allocation2 + $0x62] sm:$0xff]  ;;  %v2052_v51 = vld [vmem:[#allocation2 + $0x31] sm:$0xff]  ;;  %v2066_v59 = vld [vmem:[#allocation2 + $0x79] sm:$0xff] }
 0x10d   : > { %1675 = vmatprep.subr.mxu0 %v1223_v10  ;;  %1727 = vmatprep.subr.mxu1 %v1223_v10  ;;  %v919_v31 = vmul.f32 %v1998_v22, %v1996_v21  ;;  %v2022_v36 = vrot.slane %v741_v11, %v1074_v24  ;;  %v2024_v37 = vrot.slane %v741_v11, %v1126_v25  ;;  %v1220_v40 = vld [vmem:[%s2454_s5 + $0x40] sm:$0xff]  ;;  %v796_v60 = vld [vmem:[#allocation2 + $0x9] sm:$0xff]  ;;  %v2084_v9 = vld [vmem:[#allocation2 + $0x91] sm:$0xff] }
 0x10e   : > { %1676 = vmatpush3.msra.mxu0 %v1223_v10  ;;  %1743 = vmatpush3.msra.mxu1 %v1223_v10  ;;  %v831_v35 = vadd.f32 %v815_v28, %v763_v27  ;;  %v771_v43 = vmul.f32 %v1990_v15, %v2015_v33  ;;  %v971_v46 = vmul.f32 %v2000_v23, %v2033_v41  ;;  %v848_v61 = vld [vmem:[#allocation2 + $0xa] sm:$0xff]  ;;  %v2072_v1 = vld [vmem:[#allocation2 + $0x7a] sm:$0xff]  ;;  %v2095_v18 = vld [vmem:[#allocation2 + $0x92] sm:$0xff] }
 0x10f   : > { %1677 = vmatprep.subr.mxu0 %v1222_v26  ;;  %1728 = vmatprep.subr.mxu1 %v1222_v26  ;;  %v1023_v47 = vmul.f32 %v2013_v32, %v2035_v42  ;;  %v2056_v52 = vmul.f32 %v2020_v34, %v2046_v48  ;;  %v823_v53 = vmul.f32 %v1992_v17, %v2026_v38  ;;  %v1218_v2 = vld [vmem:[%s2454_s5 + $0x30] sm:$0xff]  ;;  %v2080_v6 = vld [vmem:[#allocation2 + $0x20] sm:$0xff]  ;;  %v1217_v12 = vld [vmem:[%s2454_s5 + $0x28] sm:$0xff] }
 0x110   : > { %1678 = vmatpush3.msra.mxu0 %v1222_v26  ;;  %1744 = vmatpush3.msra.mxu1 %v1222_v26  ;;  %v883_v45 = vadd.f32 %v867_v29, %v831_v35  ;;  %v875_v54 = vmul.f32 %v1994_v19, %v2028_v39  ;;  %v1076_v57 = vmul.f32 %v2022_v36, %v2050_v50  ;;  %v2082_v8 = vld [vmem:[#allocation2 + $0x90] sm:$0xff]  ;;  %v2099_v26 = vld [vmem:[#allocation2 + $0x21] sm:$0xff] }
 0x111   : > { %1679 = vmatprep.subr.mxu0 %v1221_v30  ;;  %1729 = vmatprep.subr.mxu1 %v1221_v30  ;;  %v1128_v58 = vmul.f32 %v2024_v37, %v2052_v51  ;;  %v839_v62 = vadd.f32 %v823_v53, %v771_v43  ;;  %v927_v63 = vmul.f32 %v1998_v22, %v2048_v49  ;;  %v2101_v27 = vld [vmem:[#allocation2 + $0x68] sm:$0xff]  ;;  %v1216_v29 = vld [vmem:[%s2454_s5 + $0x20] sm:$0xff]  ;;  %v1215_v53 = vld [vmem:[%s2454_s5 + $0x18] sm:$0xff] }
 0x112   : > { %1680 = vmatpush3.msra.mxu0 %v1221_v30  ;;  %1745 = vmatpush3.msra.mxu1 %v1221_v30  ;;  %v935_v56 = vadd.f32 %v919_v31, %v883_v45  ;;  %v979_v0 = vmul.f32 %v2000_v23, %v2066_v59  ;;  %v1031_v4 = vmul.f32 %v2013_v32, %v2072_v1  ;;  %v2103_v28 = vld [vmem:[#allocation2 + $0x69] sm:$0xff] }
 0x113   : > { %1681 = vmatprep.subr.mxu0 %v1220_v40  ;;  %1730 = vmatprep.subr.mxu1 %v1220_v40  ;;  %v764_v5 = vmul.f32 %v1990_v15, %v744_v55  ;;  %v891_v7 = vadd.f32 %v875_v54, %v839_v62  ;;  %v816_v10 = vmul.f32 %v1992_v17, %v796_v60  ;;  %v2114_v43 = vld [vmem:[#allocation2 + $0x6a] sm:$0xff] }
 0x114   : > { %1682 = vmatpush3.msra.mxu0 %v1220_v40  ;;  %1746 = vmatpush3.msra.mxu1 %v1220_v40  ;;  %v987_v3 = vadd.f32 %v971_v46, %v935_v56  ;;  %v868_v11 = vmul.f32 %v1994_v19, %v848_v61  ;;  %v1084_v14 = vmul.f32 %v2022_v36, %v2082_v8  ;;  %v2112_v40 = vld [vmem:[#allocation2 + $0x22] sm:$0xff]  ;;  %v2127_v61 = vld [vmem:[#allocation2 + $0x38] sm:$0xff] }
 0x115   : > { %1683 = vmatprep.subr.mxu0 %v1219_v44  ;;  %1731 = vmatprep.subr.mxu1 %v1219_v44  ;;  %v1136_v16 = vmul.f32 %v2024_v37, %v2084_v9  ;;  %v943_v20 = vadd.f32 %v927_v63, %v891_v7  ;;  %v832_v24 = vadd.f32 %v816_v10, %v764_v5  ;;  %v2142_v10 = vld [vmem:[#allocation2 + $0x3a] sm:$0xff] }
 0x116   : > { %1684 = vmatpush3.msra.mxu0 %v1219_v44  ;;  %1747 = vmatpush3.msra.mxu1 %v1219_v44  ;;  %v1039_v13 = vadd.f32 %v1023_v47, %v987_v3  ;;  %v920_v25 = vmul.f32 %v1998_v22, %v2080_v6  ;;  %v1188_v31 = vmul.f32 %v2020_v34, %v2095_v18  ;;  %v2118_v47 = vld [vmem:[#allocation2 + $0x80] sm:$0xff] }
 0x117   : > { %1685 = vmatprep.subr.mxu0 %v1218_v2  ;;  %1732 = vmatprep.subr.mxu1 %v1218_v2  ;;  %v972_v35 = vmul.f32 %v2000_v23, %v2099_v26  ;;  %v995_v44 = vadd.f32 %v979_v0, %v943_v20  ;;  %v884_v45 = vadd.f32 %v868_v11, %v832_v24  ;;  %v2136_v0 = vld [vmem:[#allocation2 + $0x39] sm:$0xff]  ;;  %v2144_v11 = vld [vmem:[#allocation2 + $0x81] sm:$0xff] }
 0x118   : > { %1686 = vmatpush3.msra.mxu0 %v1218_v2  ;;  %1748 = vmatpush3.msra.mxu1 %v1218_v2  ;;  %v1092_v30 = vadd.f32 %v1076_v57, %v1039_v13  ;;  %v1024_v46 = vmul.f32 %v2013_v32, %v2112_v40  ;;  %v772_v55 = vmul.f32 %v1990_v15, %v2101_v27 }
 0x119   : > { %1687 = vmatprep.subr.mxu0 %v1217_v12  ;;  %1733 = vmatprep.subr.mxu1 %v1217_v12  ;;  %v824_v56 = vmul.f32 %v1992_v17, %v2103_v28  ;;  %v1047_v57 = vadd.f32 %v1031_v4, %v995_v44  ;;  %v936_v60 = vadd.f32 %v920_v25, %v884_v45 }
 0x11a   : > { %1688 = vmatpush3.msra.mxu0 %v1217_v12  ;;  %1749 = vmatpush3.msra.mxu1 %v1217_v12  ;;  %v1144_v54 = vadd.f32 %v1128_v58, %v1092_v30  ;;  %v876_v62 = vmul.f32 %v1994_v19, %v2114_v43  ;;  %v1214_v58 = vld [vmem:[%s2454_s5 + $0x10] sm:$0xff]  ;;  %v1077_v63 = vmul.f32 %v2022_v36, %v2127_v61  ;;  %v1213_v12 = vld [vmem:[%s2454_s5 + $0x8] sm:$0xff] }
 0x11b   : > { %1689 = vmatprep.subr.mxu0 %v1216_v29  ;;  %1734 = vmatprep.subr.mxu1 %v1216_v29  ;;  %v840_v2 = vadd.f32 %v824_v56, %v772_v55  ;;  %v928_v3 = vmul.f32 %v1998_v22, %v2118_v47  ;;  %v1100_v4 = vadd.f32 %v1084_v14, %v1047_v57  ;;  %v2154_v30 = vld [vmem:[#allocation2 + $0x82] sm:$0xff] }
 0x11c   : > { %1690 = vmatpush3.msra.mxu0 %v1216_v29  ;;  %1750 = vmatpush3.msra.mxu1 %v1216_v29  ;;  %v988_v5 = vadd.f32 %v972_v35, %v936_v60  ;;  %v1129_v7 = vmul.f32 %v2024_v37, %v2136_v0  ;;  %v1181_v13 = vmul.f32 %v2020_v34, %v2142_v10  ;;  %v1212_v35 = vld [vmem:[%s2454_s5] sm:$0xff] }
 0x11d   : > { %1691 = vmatprep.subr.mxu0 %v1215_v53  ;;  %1735 = vmatprep.subr.mxu1 %v1215_v53  ;;  %v892_v20 = vadd.f32 %v876_v62, %v840_v2  ;;  %v980_v14 = vmul.f32 %v2000_v23, %v2144_v11  ;;  %v1196_v24 = vadd.f32 %v2056_v52, %v1144_v54  ;;  %v2171_v60 = vld [vmem:[#allocation2 + $0x99] sm:$0xff] }
 0x11e   : > { %1692 = vmatpush3.msra.mxu0 %v1215_v53  ;;  %1751 = vmatpush3.msra.mxu1 %v1215_v53  ;;  %v1152_v25 = vadd.f32 %v1136_v16, %v1100_v4  ;;  %v1040_v29 = vadd.f32 %v1024_v46, %v988_v5  ;;  %v1032_v45 = vmul.f32 %v2013_v32, %v2154_v30  ;;  %v2163_v46 = vld [vmem:[#allocation2 + $0x98] sm:$0xff] }
 0x11f   : > { %1693 = vmatprep.subr.mxu0 %v1214_v58  ;;  %1736 = vmatprep.subr.mxu1 %v1214_v58  ;;  %v944_v44 = vadd.f32 %v928_v3, %v892_v20  ;;  %v765_v53 = vmul.f32 %v1996_v21, %v1990_v15  ;;  %v817_v54 = vmul.f32 %v2033_v41, %v1992_v17  ;;  %v2177_v2 = vld [vmem:[#allocation2 + $0x9a] sm:$0xff] }
 0x120   : > { %1694 = vmatpush3.msra.mxu0 %v1214_v58  ;;  %1752 = vmatpush3.msra.mxu1 %v1214_v58  ;;  %v1204_v52 = vadd.f32 %v1188_v31, %v1152_v25  ;;  %v1093_v16 = vadd.f32 %v1077_v63, %v1040_v29  ;;  %v1085_v56 = vmul.f32 %v2022_v36, %v2163_v46  ;;  %v2191_v25 = vld [vmem:[#allocation2 + $0x48] sm:$0xff] }
 0x121   : > { %1695 = vmatprep.subr.mxu0 %v1213_v12  ;;  %1737 = vmatprep.subr.mxu1 %v1213_v12  ;;  %v996_v55 = vadd.f32 %v980_v14, %v944_v44  ;;  %v869_v57 = vmul.f32 %v2035_v42, %v1994_v19  ;;  %v833_v31 = vadd.f32 %v817_v54, %v765_v53  ;;  %v2201_v54 = vld [vmem:[#allocation2 + $0x49] sm:$0xff] }
 0x122   : > { %1696 = vmatpush3.msra.mxu0 %v1213_v12  ;;  %1753 = vmatpush3.msra.mxu1 %v1213_v12  ;;  %v1145_v21 = vadd.f32 %v1129_v7, %v1093_v16  ;;  %v921_v62 = vmul.f32 %v2050_v50, %v1998_v22  ;;  %v1137_v58 = vmul.f32 %v2024_v37, %v2171_v60 }
 0x123   : > { %1697 = vmatprep.subr.mxu0 %v1212_v35  ;;  %1738 = vmatprep.subr.mxu1 %v1212_v35  ;;  %v1048_v41 = vadd.f32 %v1032_v45, %v996_v55  ;;  %v885_v42 = vadd.f32 %v869_v57, %v833_v31  ;;  %v973_v3 = vmul.f32 %v2052_v51, %v2000_v23  ;;  %v2203_v55 = vld [vmem:[#allocation2 + $0x4a] sm:$0xff] }
 0x124   : > { %1698 = vmatpush3.msra.mxu0 %v1212_v35  ;;  %1754 = vmatpush3.msra.mxu1 %v1212_v35  ;;  %v1197_v63 = vadd.f32 %v1181_v13, %v1145_v21  ;;  %v1189_v5 = vmul.f32 %v2020_v34, %v2177_v2  ;;  %v773_v7 = vmul.f32 %v2048_v49, %v1990_v15 }
 0x125   : > { %1699 = vmatprep.mubr.f32.mxu0 %v1196_v24  ;;  %1711 = vmatprep.mubr.f32.mxu1 %v1204_v52  ;;  %v1101_v4 = vadd.f32 %v1085_v56, %v1048_v41  ;;  %v825_v12 = vmul.f32 %v2066_v59, %v1992_v17  ;;  %v937_v20 = vadd.f32 %v921_v62, %v885_v42  ;;  %v2219_v42 = vld [vmem:[#allocation2 + $0xa9] sm:$0xff] }
 0x126   : > { %1700 = vmatmul.mubr.f32.vlgmr.msra.gmra.mxu0 %v1197_v63  ;;  %v1025_v13 = vmul.f32 %v2046_v48, %v2013_v32  ;;  %v877_v14 = vmul.f32 %v2072_v1, %v1994_v19  ;;  %v929_v35 = vmul.f32 %v2082_v8, %v1998_v22  ;;  %v1078_v45 = vmul.f32 %v2022_v36, %v2191_v25 }
 0x127   : > { %v1153_v24 = vadd.f32 %v1137_v58, %v1101_v4  ;;  %v841_v29 = vadd.f32 %v825_v12, %v773_v7  ;;  %v989_v44 = vadd.f32 %v973_v3, %v937_v20  ;;  %v981_v53 = vmul.f32 %v2084_v9, %v2000_v23  ;;  %v2215_v58 = vld [vmem:[#allocation2 + $0xa8] sm:$0xff] }
 0x128   : > { %v766_v52 = vmul.f32 %v2080_v6, %v1990_v15  ;;  %v818_v57 = vmul.f32 %v2099_v26, %v1992_v17  ;;  %v870_v21 = vmul.f32 %v2112_v40, %v1994_v19  ;;  %v1130_v62 = vmul.f32 %v2024_v37, %v2201_v54 }
 0x129   : > { %v1205_v16 = vadd.f32 %v1189_v5, %v1153_v24  ;;  %v893_v56 = vadd.f32 %v877_v14, %v841_v29  ;;  %v1041_v31 = vadd.f32 %v1025_v13, %v989_v44  ;;  %v1182_v41 = vmul.f32 %v2020_v34, %v2203_v55  ;;  %v2229_v13 = vld [vmem:[#allocation2 + $0xaa] sm:$0xff] }
 0x12a   : > { %v1033_v6 = vmul.f32 %v2095_v18, %v2013_v32  ;;  %v1086_v26 = vmul.f32 %v2022_v36, %v2215_v58  ;;  %v834_v40 = vadd.f32 %v818_v57, %v766_v52  ;;  %v922_v3 = vmul.f32 %v2127_v61, %v1998_v22 }
 0x12b   : > { %1712 = vmatmul.mubr.f32.vlgmr.msra.gmra.mxu1 %v1205_v16  ;;  %v945_v63 = vadd.f32 %v929_v35, %v893_v56  ;;  %v1094_v4 = vadd.f32 %v1078_v45, %v1041_v31  ;;  %v1138_v5 = vmul.f32 %v2024_v37, %v2219_v42  ;;  %v774_v7 = vmul.f32 %v2118_v47, %v1990_v15  ;;  %v2237_v45 = vld [vmem:[#allocation2 + $0x50] sm:$0xff] }
 0x12c   : > { %v826_v12 = vmul.f32 %v2144_v11, %v1992_v17  ;;  %v886_v14 = vadd.f32 %v870_v21, %v834_v40  ;;  %v974_v24 = vmul.f32 %v2136_v0, %v2000_v23  ;;  %v878_v29 = vmul.f32 %v2154_v30, %v1994_v19 }
 0x12d   : > { %v997_v20 = vadd.f32 %v981_v53, %v945_v63  ;;  %v1146_v35 = vadd.f32 %v1130_v62, %v1094_v4  ;;  %v1190_v44 = vmul.f32 %v2020_v34, %v2229_v13  ;;  %v930_v16 = vmul.f32 %v2163_v46, %v1998_v22 }
 0x12e   : > { %v842_v52 = vadd.f32 %v826_v12, %v774_v7  ;;  %v938_v56 = vadd.f32 %v922_v3, %v886_v14  ;;  %v1026_v57 = vmul.f32 %v2142_v10, %v2013_v32  ;;  %v1079_v21 = vmul.f32 %v2022_v36, %v2237_v45  ;;  %v2249_v12 = vld [vmem:[#allocation2 + $0x51] sm:$0xff] }
 0x12f   : > { %v1049_v53 = vadd.f32 %v1033_v6, %v997_v20  ;;  %v1198_v31 = vadd.f32 %v1182_v41, %v1146_v35  ;;  %v982_v62 = vmul.f32 %v2171_v60, %v2000_v23  ;;  %v767_v40 = vmul.f32 %v2050_v50, %v1990_v15  ;;  %v2251_v6 = vld [vmem:[#allocation2 + $0x52] sm:$0xff] }
 0x130   : > { %v894_v63 = vadd.f32 %v878_v29, %v842_v52  ;;  %v990_v7 = vadd.f32 %v974_v24, %v938_v56  ;;  %v819_v3 = vmul.f32 %v2052_v51, %v1992_v17  ;;  %v871_v20 = vmul.f32 %v2046_v48, %v1994_v19  ;;  %v2263_v35 = vld [vmem:[#allocation2 + $0xb0] sm:$0xff] }
 0x131   : > { %v1102_v4 = vadd.f32 %v1086_v26, %v1049_v53  ;;  %1702 = vmatprep.mubr.f32.mxu0 %v1198_v31  ;;  %v1131_v41 = vmul.f32 %v2024_v37, %v2249_v12  ;;  %v1183_v14 = vmul.f32 %v2020_v34, %v2251_v6  ;;  %v1034_v26 = vmul.f32 %v2177_v2, %v2013_v32 }
 0x132   : > { %v946_v50 = vadd.f32 %v930_v16, %v894_v63  ;;  %v1042_v29 = vadd.f32 %v1026_v57, %v990_v7  ;;  %v835_v52 = vadd.f32 %v819_v3, %v767_v40  ;;  %v923_v51 = vmul.f32 %v2191_v25, %v1998_v22 }
 0x133   : > { %v1154_v24 = vadd.f32 %v1138_v5, %v1102_v4  ;;  %v1087_v53 = vmul.f32 %v2022_v36, %v2263_v35  ;;  %v975_v56 = vmul.f32 %v2201_v54, %v2000_v23  ;;  %v775_v16 = vmul.f32 %v2082_v8, %v1990_v15  ;;  %v2273_v5 = vld [vmem:[#allocation2 + $0xb1] sm:$0xff] }
 0x134   : > { %v998_v48 = vadd.f32 %v982_v62, %v946_v50  ;;  %v1095_v63 = vadd.f32 %v1079_v21, %v1042_v29  ;;  %v887_v57 = vadd.f32 %v871_v20, %v835_v52  ;;  %v827_v40 = vmul.f32 %v2084_v9, %v1992_v17 }
 0x135   : > { %v1206_v31 = vadd.f32 %v1190_v44, %v1154_v24  ;;  %v1139_v62 = vmul.f32 %v2024_v37, %v2273_v5  ;;  %v1027_v7 = vmul.f32 %v2203_v55, %v2013_v32  ;;  %v879_v3 = vmul.f32 %v2095_v18, %v1994_v19  ;;  %v2283_v44 = vld [vmem:[#allocation2 + $0xb2] sm:$0xff] }
 0x136   : > { %v1050_v4 = vadd.f32 %v1034_v26, %v998_v48  ;;  %v1147_v8 = vadd.f32 %v1131_v41, %v1095_v63  ;;  %v939_v21 = vadd.f32 %v923_v51, %v887_v57  ;;  %v843_v50 = vadd.f32 %v827_v40, %v775_v16 }
 0x137   : > { %1714 = vmatprep.mubr.f32.mxu1 %v1206_v31  ;;  %v931_v20 = vmul.f32 %v2215_v58, %v1998_v22  ;;  %v1191_v26 = vmul.f32 %v2020_v34, %v2283_v44  ;;  %v1080_v24 = vmul.f32 %v2022_v36, %v2015_v33  ;;  %v983_v29 = vmul.f32 %v2219_v42, %v2000_v23 }
 0x138   : > { %v1103_v9 = vadd.f32 %v1087_v53, %v1050_v4  ;;  %v1199_v18 = vadd.f32 %v1183_v14, %v1147_v8  ;;  %v991_v52 = vadd.f32 %v975_v56, %v939_v21  ;;  %v895_v41 = vadd.f32 %v879_v3, %v843_v50  ;;  %v2311_v50 = vld [vmem:[#allocation2 + $0xc2] sm:$0xff] }
 0x139   : > { %v768_v51 = vmul.f32 %v2127_v61, %v1990_v15  ;;  %v1132_v16 = vmul.f32 %v2024_v37, %v2026_v38  ;;  %v820_v53 = vmul.f32 %v2136_v0, %v1992_v17  ;;  %v872_v31 = vmul.f32 %v2142_v10, %v1994_v19  ;;  %v1068_v61 = vld [vmem:[#allocation2 + $0xc0] sm:$0xff] }
 0x13a   : > { %v1155_v48 = vadd.f32 %v1139_v62, %v1103_v9  ;;  %1703 = vmatmul.mubr.f32.gmra.mxu0 %v1199_v18  ;;  %v1043_v63 = vadd.f32 %v1027_v7, %v991_v52  ;;  %v1184_v14 = vmul.f32 %v2020_v34, %v2028_v39  ;;  %v947_v56 = vadd.f32 %v931_v20, %v895_v41  ;;  %v1120_v62 = vld [vmem:[#allocation2 + $0xc1] sm:$0xff] }
 0x13b   : > { %v1035_v57 = vmul.f32 %v2229_v13, %v2013_v32  ;;  %v1088_v4 = vmul.f32 %v2022_v36, %v1068_v61  ;;  %v836_v3 = vadd.f32 %v820_v53, %v768_v51  ;;  %v924_v0 = vmul.f32 %v2237_v45, %v1998_v22 }
 0x13c   : > { %v1207_v40 = vadd.f32 %v1191_v26, %v1155_v48  ;;  %v1096_v8 = vadd.f32 %v1080_v24, %v1043_v63  ;;  %v999_v10 = vadd.f32 %v983_v29, %v947_v56  ;;  %v1140_v7 = vmul.f32 %v2024_v37, %v1120_v62 }
 0x13d   : > { %v776_v21 = vmul.f32 %v2163_v46, %v1990_v15  ;;  %v888_v20 = vadd.f32 %v872_v31, %v836_v3  ;;  %v976_v9 = vmul.f32 %v2249_v12, %v2000_v23  ;;  %v828_v26 = vmul.f32 %v2171_v60, %v1992_v17 }
 0x13e   : > { %1715 = vmatmul.mubr.f32.gmra.mxu1 %v1207_v40  ;;  %v880_v18 = vmul.f32 %v2177_v2, %v1994_v19  ;;  %v1148_v24 = vadd.f32 %v1132_v16, %v1096_v8  ;;  %v1051_v29 = vadd.f32 %v1035_v57, %v999_v10  ;;  %v1192_v52 = vmul.f32 %v2020_v34, %v2311_v50  ;;  %v1069_v10 = vld [vmem:[#allocation2 + $0xc8] sm:$0xff] }
 0x13f   : > { %v1028_v46 = vmul.f32 %v2251_v6, %v2013_v32  ;;  %v940_v41 = vadd.f32 %v924_v0, %v888_v20  ;;  %v1081_v51 = vmul.f32 %v2022_v36, %v2101_v27  ;;  %v844_v48 = vadd.f32 %v828_v26, %v776_v21 }
 0x140   : > { %v932_v53 = vmul.f32 %v2263_v35, %v1998_v22  ;;  %v1200_v60 = vadd.f32 %v1184_v14, %v1148_v24  ;;  %v1104_v31 = vadd.f32 %v1088_v4, %v1051_v29  ;;  %v984_v2 = vmul.f32 %v2273_v5, %v2000_v23  ;;  %v1121_v24 = vld [vmem:[#allocation2 + $0xc9] sm:$0xff] }
 0x141   : > { %v769_v16 = vmul.f32 %v2191_v25, %v1990_v15  ;;  %v992_v63 = vadd.f32 %v976_v9, %v940_v41  ;;  %v896_v56 = vadd.f32 %v880_v18, %v844_v48  ;;  %v821_v57 = vmul.f32 %v2201_v54, %v1992_v17 }
 0x142   : > { %v873_v40 = vmul.f32 %v2203_v55, %v1994_v19  ;;  %1705 = vmatprep.mubr.f32.mxu0 %v1200_v60  ;;  %v1156_v3 = vadd.f32 %v1140_v7, %v1104_v31  ;;  %v1133_v14 = vmul.f32 %v2024_v37, %v2103_v28  ;;  %v1185_v4 = vmul.f32 %v2020_v34, %v2114_v43 }
 0x143   : > { %v1036_v0 = vmul.f32 %v2283_v44, %v2013_v32  ;;  %v1044_v25 = vadd.f32 %v1028_v46, %v992_v63  ;;  %v948_v8 = vadd.f32 %v932_v53, %v896_v56  ;;  %v837_v21 = vadd.f32 %v821_v57, %v769_v16 }
 0x144   : > { %v925_v54 = vmul.f32 %v1998_v22, %v2015_v33  ;;  %v1208_v20 = vadd.f32 %v1192_v52, %v1156_v3  ;;  %v1089_v55 = vmul.f32 %v2022_v36, %v1069_v10  ;;  %v977_v7 = vmul.f32 %v2000_v23, %v2026_v38 }
 0x145   : > { %v777_v9 = vmul.f32 %v2215_v58, %v1990_v15  ;;  %v1097_v26 = vadd.f32 %v1081_v51, %v1044_v25  ;;  %v1000_v18 = vadd.f32 %v984_v2, %v948_v8  ;;  %v889_v29 = vadd.f32 %v873_v40, %v837_v21  ;;  %v1173_v51 = vld [vmem:[#allocation2 + $0xca] sm:$0xff]  ;;  %v1122_v25 = vld [vmem:[#allocation2 + $0xd9] sm:$0xff] }
 0x146   : > { %v829_v46 = vmul.f32 %v2219_v42, %v1992_v17  ;;  %1717 = vmatprep.mubr.f32.mxu1 %v1208_v20  ;;  %v1141_v41 = vmul.f32 %v2024_v37, %v1121_v24  ;;  %v1029_v33 = vmul.f32 %v2013_v32, %v2028_v39  ;;  %v881_v52 = vmul.f32 %v2229_v13, %v1994_v19  ;;  %v1174_v20 = vld [vmem:[#allocation2 + $0xda] sm:$0xff] }
 0x147   : > { %v933_v38 = vmul.f32 %v1068_v61, %v1998_v22  ;;  %v1149_v48 = vadd.f32 %v1133_v14, %v1097_v26  ;;  %v1052_v58 = vadd.f32 %v1036_v0, %v1000_v18  ;;  %v941_v53 = vadd.f32 %v925_v54, %v889_v29  ;;  %v1070_v61 = vld [vmem:[#allocation2 + $0xd8] sm:$0xff] }
 0x148   : > { %v845_v60 = vadd.f32 %v829_v46, %v777_v9  ;;  %v1193_v31 = vmul.f32 %v2020_v34, %v1173_v51  ;;  %v1082_v42 = vmul.f32 %v2022_v36, %v2048_v49  ;;  %v985_v2 = vmul.f32 %v1120_v62, %v2000_v23 }
 0x149   : > { %v770_v39 = vmul.f32 %v2237_v45, %v1990_v15  ;;  %v1201_v16 = vadd.f32 %v1185_v4, %v1149_v48  ;;  %v1105_v63 = vadd.f32 %v1089_v55, %v1052_v58  ;;  %v993_v13 = vadd.f32 %v977_v7, %v941_v53  ;;  %v1123_v58 = vld [vmem:[#allocation2 + $0xe1] sm:$0xff] }
 0x14a   : > { %v897_v56 = vadd.f32 %v881_v52, %v845_v60  ;;  %v1134_v57 = vmul.f32 %v2024_v37, %v2066_v59  ;;  %v822_v40 = vmul.f32 %v2249_v12, %v1992_v17  ;;  %v874_v3 = vmul.f32 %v2251_v6, %v1994_v19  ;;  %v1071_v52 = vld [vmem:[#allocation2 + $0xe0] sm:$0xff] }
 0x14b   : > { %1706 = vmatmul.mubr.f32.gmra.mxu0 %v1201_v16  ;;  %v1157_v49 = vadd.f32 %v1141_v41, %v1105_v63  ;;  %v1045_v62 = vadd.f32 %v1029_v33, %v993_v13  ;;  %v1037_v45 = vmul.f32 %v2311_v50, %v2013_v32  ;;  %v1186_v4 = vmul.f32 %v2020_v34, %v2072_v1 }
 0x14c   : > { %v949_v14 = vadd.f32 %v933_v38, %v897_v56  ;;  %v1090_v0 = vmul.f32 %v2022_v36, %v1070_v61  ;;  %v838_v59 = vadd.f32 %v822_v40, %v770_v39  ;;  %v926_v12 = vmul.f32 %v1998_v22, %v2101_v27 }
 0x14d   : > { %v1209_v8 = vadd.f32 %v1193_v31, %v1157_v49  ;;  %v1098_v21 = vadd.f32 %v1082_v42, %v1045_v62  ;;  %v778_v54 = vmul.f32 %v2263_v35, %v1990_v15  ;;  %v978_v50 = vmul.f32 %v2000_v23, %v2103_v28 }
 0x14e   : > { %v1001_v6 = vadd.f32 %v985_v2, %v949_v14  ;;  %v890_v55 = vadd.f32 %v874_v3, %v838_v59  ;;  %v830_v1 = vmul.f32 %v2273_v5, %v1992_v17  ;;  %v882_v7 = vmul.f32 %v2283_v44, %v1994_v19 }
 0x14f   : > { %1718 = vmatmul.mubr.f32.gmra.mxu1 %v1209_v8  ;;  %v1150_v9 = vadd.f32 %v1134_v57, %v1098_v21  ;;  %v1142_v26 = vmul.f32 %v2024_v37, %v1122_v25  ;;  %v1030_v15 = vmul.f32 %v2013_v32, %v2114_v43  ;;  %v934_v29 = vmul.f32 %v1069_v10, %v1998_v22 }
 0x150   : > { %v1053_v27 = vadd.f32 %v1037_v45, %v1001_v6  ;;  %v942_v18 = vadd.f32 %v926_v12, %v890_v55  ;;  %v846_v35 = vadd.f32 %v830_v1, %v778_v54  ;;  %v1194_v41 = vmul.f32 %v2020_v34, %v1174_v20 }
 0x151   : > { %v1202_v46 = vadd.f32 %v1186_v4, %v1150_v9  ;;  %v1083_v19 = vmul.f32 %v2022_v36, %v2118_v47  ;;  %v986_v44 = vmul.f32 %v1121_v24, %v2000_v23  ;;  %v1135_v43 = vmul.f32 %v2024_v37, %v2144_v11  ;;  %v1175_v23 = vld [vmem:[#allocation2 + $0xe2] sm:$0xff] }
 0x152   : > { %v1106_v28 = vadd.f32 %v1090_v0, %v1053_v27  ;;  %v994_v17 = vadd.f32 %v978_v50, %v942_v18  ;;  %v898_v5 = vadd.f32 %v882_v7, %v846_v35  ;;  %v1038_v22 = vmul.f32 %v1173_v51, %v2013_v32 }
 0x153   : > { %1708 = vmatprep.mubr.f32.mxu0 %v1202_v46  ;;  %v1187_v60 = vmul.f32 %v2020_v34, %v2154_v30  ;;  %v1091_v31 = vmul.f32 %v2022_v36, %v1071_v52  ;;  %v1143_v2 = vmul.f32 %v2024_v37, %v1123_v58  ;;  %v1195_v32 = vmul.f32 %v2020_v34, %v1175_v23  ;;  %v1576_v36 = vld [vmem:[%s2455_s6] ss:$0 sm:$0xff] }
 0x154   : > { %v1158_v33 = vadd.f32 %v1142_v26, %v1106_v28  ;;  %v1046_v38 = vadd.f32 %v1030_v15, %v994_v17  ;;  %v950_v48 = vadd.f32 %v934_v29, %v898_v5 }
 0x156   : > { %v1210_v10 = vadd.f32 %v1194_v41, %v1158_v33  ;;  %v1099_v53 = vadd.f32 %v1083_v19, %v1046_v38  ;;  %v1002_v47 = vadd.f32 %v986_v44, %v950_v48 }
 0x158   : > { %1720 = vmatprep.mubr.f32.mxu1 %v1210_v10  ;;  %v1151_v24 = vadd.f32 %v1135_v43, %v1099_v53  ;;  %v1054_v42 = vadd.f32 %v1038_v22, %v1002_v47 }
 0x15a   : > { %v1203_v11 = vadd.f32 %v1187_v60, %v1151_v24  ;;  %v1107_v39 = vadd.f32 %v1091_v31, %v1054_v42 }
 0x15c   : > { %1709 = vmatmul.mubr.f32.gmra.mxu0 %v1203_v11  ;;  %v1159_v51 = vadd.f32 %v1143_v2, %v1107_v39 }
 0x15e   : > { %v1211_v16 = vadd.f32 %v1195_v32, %v1159_v51 }
 0x160   : > { %1721 = vmatmul.mubr.f32.gmra.mxu1 %v1211_v16 }
 0x1e6   : > { %v1701_v30 = vpop.f32.mrf.mxu0 }
 0x1e7   : > { %v1307_v63 = vadd.f32 %v1701_v30, %v1576_v36 }
 0x1e8   : > { %v1301_v13 = vpop.f32.mrf.mxu0 }
 0x1e9   : > { %v1381_v37 = vmax.f32 %v1307_v63, 0.0  ;;  %v1302_v56 = vadd.f32 %v1576_v36, %v1301_v13 }
 0x1eb   : > { %1398 = vst.msk [vmem:[%s1926_s22 + $0x8] sm:$0xff] %vm1396_vm2, %v1381_v37  ;;  %v1713_v34 = vpop.f32.mrf.mxu1  ;;  %v1380_v61 = vmax.f32 %v1302_v56, 0.0 }
 0x1ec   : > { %v1347_v57 = vadd.f32 %v1713_v34, %v1576_v36 }
 0x1ed   : > { %1397 = vst.msk [vmem:[%s1926_s22] sm:$0xff] %vm1396_vm2, %v1380_v61  ;;  %v1341_v40 = vpop.f32.mrf.mxu1 }
 0x1ee   : > { %v1389_v3 = vmax.f32 %v1347_v57, 0.0  ;;  %v1342_v49 = vadd.f32 %v1576_v36, %v1341_v40 }
 0x1f0   : > { %1406 = vst.msk [vmem:[%s1926_s22 + $0x48] sm:$0xff] %vm1396_vm2, %v1389_v3  ;;  %v1388_v62 = vmax.f32 %v1342_v49, 0.0 }
 0x1f2   : > { %1405 = vst.msk [vmem:[%s1926_s22 + $0x40] sm:$0xff] %vm1396_vm2, %v1388_v62 }
 0x1fa   : > { %v1704_v14 = vpop.f32.mrf.mxu0 }
 0x1fb   : > { %v1317_v45 = vadd.f32 %v1704_v14, %v1576_v36 }
 0x1fc   : > { %v1311_v4 = vpop.f32.mrf.mxu0 }
 0x1fd   : > { %v1383_v0 = vmax.f32 %v1317_v45, 0.0  ;;  %v1312_v59 = vadd.f32 %v1576_v36, %v1311_v4 }
 0x1fe   : > { %v1716_v25 = vpop.f32.mrf.mxu1 }
 0x1ff   : > { %v1357_v12 = vadd.f32 %v1716_v25, %v1576_v36  ;;  %1400 = vst.msk [vmem:[%s1926_s22 + $0x18] sm:$0xff] %vm1396_vm2, %v1383_v0  ;;  %v1382_v8 = vmax.f32 %v1312_v59, 0.0 }
 0x200   : > { %v1351_v21 = vpop.f32.mrf.mxu1 }
 0x201   : > { %v1391_v6 = vmax.f32 %v1357_v12, 0.0  ;;  %v1352_v54 = vadd.f32 %v1576_v36, %v1351_v21  ;;  %1399 = vst.msk [vmem:[%s1926_s22 + $0x10] sm:$0xff] %vm1396_vm2, %v1382_v8 }
 0x203   : > { %1408 = vst.msk [vmem:[%s1926_s22 + $0x58] sm:$0xff] %vm1396_vm2, %v1391_v6  ;;  %v1390_v20 = vmax.f32 %v1352_v54, 0.0 }
 0x205   : > { %1407 = vst.msk [vmem:[%s1926_s22 + $0x50] sm:$0xff] %vm1396_vm2, %v1390_v20 }
 0x20b   : > { %v1707_v55 = vpop.f32.mrf.mxu0 }
 0x20c   : > { %v1327_v50 = vadd.f32 %v1707_v55, %v1576_v36 }
 0x20d   : > { %v1321_v1 = vpop.f32.mrf.mxu0 }
 0x20e   : > { %v1385_v7 = vmax.f32 %v1327_v50, 0.0  ;;  %v1322_v9 = vadd.f32 %v1576_v36, %v1321_v1 }
 0x20f   : > { %v1719_v27 = vpop.f32.mrf.mxu1 }
 0x210   : > { %1402 = vst.msk [vmem:[%s1926_s22 + $0x28] sm:$0xff] %vm1396_vm2, %v1385_v7  ;;  %v1367_v26 = vadd.f32 %v1719_v27, %v1576_v36  ;;  %v1384_v18 = vmax.f32 %v1322_v9, 0.0 }
 0x211   : > { %v1361_v15 = vpop.f32.mrf.mxu1 }
 0x212   : > { %v1393_v35 = vmax.f32 %v1367_v26, 0.0  ;;  %1401 = vst.msk [vmem:[%s1926_s22 + $0x20] sm:$0xff] %vm1396_vm2, %v1384_v18  ;;  %v1362_v29 = vadd.f32 %v1576_v36, %v1361_v15 }
 0x214   : > { %1410 = vst.msk [vmem:[%s1926_s22 + $0x68] sm:$0xff] %vm1396_vm2, %v1393_v35  ;;  %v1392_v46 = vmax.f32 %v1362_v29, 0.0 }
 0x216   : > { %1409 = vst.msk [vmem:[%s1926_s22 + $0x60] sm:$0xff] %vm1396_vm2, %v1392_v46 }
 0x21c   : > { %v1710_v28 = vpop.f32.mrf.mxu0 }
 0x21d   : > { %v1337_v41 = vadd.f32 %v1710_v28, %v1576_v36 }
 0x21e   : > { %v1331_v17 = vpop.f32.mrf.mxu0 }
 0x21f   : > { %v1387_v19 = vmax.f32 %v1337_v41, 0.0  ;;  %v1332_v5 = vadd.f32 %v1576_v36, %v1331_v17 }
 0x220   : > { %v1722_v44 = vpop.f32.mrf.mxu1 }
 0x221   : > { %1404 = vst.msk [vmem:[%s1926_s22 + $0x38] sm:$0xff] %vm1396_vm2, %v1387_v19  ;;  %v1377_v33 = vadd.f32 %v1722_v44, %v1576_v36  ;;  %v1386_v52 = vmax.f32 %v1332_v5, 0.0 }
 0x222   : > { %v1371_v38 = vpop.f32.mrf.mxu1 }
 0x223   : > { %v1395_v43 = vmax.f32 %v1377_v33, 0.0  ;;  %1403 = vst.msk [vmem:[%s1926_s22 + $0x30] sm:$0xff] %vm1396_vm2, %v1386_v52  ;;  %v1372_v48 = vadd.f32 %v1576_v36, %v1371_v38 }
 0x225   : > { %1412 = vst.msk [vmem:[%s1926_s22 + $0x78] sm:$0xff] %vm1396_vm2, %v1395_v43  ;;  %v1394_v22 = vmax.f32 %v1372_v48, 0.0 }
 0x227   : > { %1411 = vst.msk [vmem:[%s1926_s22 + $0x70] sm:$0xff] %vm1396_vm2, %v1394_v22 }
 0x228 PF: > { %s17_s28 = sadd.s32 1, %s1836_s28   ;;  %s2457_s24 = smov %s1828_s26 }
 0x229   : > { %p14_p10 = scmp.ge.s32.totalorder %s17_s28, 6   ;;  %s2458_s25 = smov %s1832_s27 }
 0x22a   : > { %s2459_s26 = smov %s2462_s29  ;;  %s2460_s27 = smov %s2466_s30 }
 0x22b   :  { %16 = sbr.rel (!%p14_p10) target bundleno = 3 (0x3), region = 92 }

</bundles_post_ra>
